<compile_context>
chip_gen: v7x
topology: tpu7x:2x2x1
jax: 0.10.0
libtpu: 0.0.40
codegen_flags: <defaults>
</compile_context>

<pallas_src>
import functools

import jax
import jax.numpy as jnp
from jax import lax
from jax.experimental import pallas as pl
from jax.experimental.pallas import tpu as pltpu


def attention_kernel(x_ref, wqkv_ref, wproj_ref, bproj_ref, o_ref, cat_ref, *,
                     num_heads, tokens_per_block, n_valid, compute_dtype):
    rows, C = x_ref.shape
    Np = tokens_per_block               # (padded) tokens per batch element
    bb = rows // Np                     # batch elements handled this grid step
    H = num_heads
    hd = C // H

    x = x_ref[...]                      # (rows, C)
    wqkv = wqkv_ref[...]                # (C, 3C), Q columns pre-scaled
    wproj = wproj_ref[...]              # (C, C)
    if compute_dtype is not None:       # bf16 MXU inputs, f32 accumulation
        x = x.astype(compute_dtype)
        wqkv = wqkv.astype(compute_dtype)
        wproj = wproj.astype(compute_dtype)

    # ---- QKV projection: one (rows, C) x (C, 3C) MXU matmul ----
    qkv = jnp.dot(x, wqkv, preferred_element_type=jnp.float32)   # (rows, 3C) f32

    def split_heads(a):
        # (rows, C) -> (H*bb, Np, hd): per-head lane slices stacked along a new
        # leading (batch) axis.  Done once per tensor per grid step; no
        # per-batch Python loop remains.
        parts = [a[:, h * hd:(h + 1) * hd].reshape(bb, Np, hd) for h in range(H)]
        return jnp.stack(parts, axis=0).reshape(H * bb, Np, hd)

    q = split_heads(qkv[:, 0:C])        # scale already folded into W_qkv
    k = split_heads(qkv[:, C:2 * C])
    v = split_heads(qkv[:, 2 * C:3 * C])
    if compute_dtype is not None:
        q = q.astype(compute_dtype)
        k = k.astype(compute_dtype)
        v = v.astype(compute_dtype)

    # ---- Scores: one batched dot_general over all (head, batch) pairs ----
    s = jnp.einsum('bqd,bkd->bqk', q, k,
                   preferred_element_type=jnp.float32)           # (H*bb, Np, Np)

    if n_valid < Np:                    # mask padded key tokens (static check)
        key_idx = lax.broadcasted_iota(jnp.int32, s.shape, 2)
        s = jnp.where(key_idx < n_valid, s, -1e30)

    # ---- Softmax in f32 (EUP approx reciprocal for the normalization) ----
    s = s - jnp.max(s, axis=-1, keepdims=True)
    p = jnp.exp(s)
    p = p * pl.reciprocal(jnp.sum(p, axis=-1, keepdims=True), approx=True)
    # attn_drop is identity (p = 0.0)
    if compute_dtype is not None:
        p = p.astype(compute_dtype)

    # ---- Context: one batched dot_general ----
    ctx = jnp.einsum('bqk,bkd->bqd', p, v,
                     preferred_element_type=jnp.float32)         # (H*bb, Np, hd)

    # ---- Head concat via lane-slice stores into VMEM scratch ----
    # Column c = h*hd + d matches the PyTorch transpose(1,2).reshape(B,N,C).
    ctx = ctx.reshape(H, bb * Np, hd)
    for h in range(H):
        cat_ref[:, h * hd:(h + 1) * hd] = ctx[h].astype(cat_ref.dtype)

    # ---- Output projection: single full-K (rows, C) x (C, C) MXU matmul ----
    out = jnp.dot(cat_ref[...], wproj, preferred_element_type=jnp.float32)
    out = out + bproj_ref[...].astype(jnp.float32)
    # proj_drop is identity (p = 0.0)
    o_ref[...] = out.astype(o_ref.dtype)


def _choose_batch_block(B, n_pad, target_rows):
    """Largest divisor bb of B with bb*n_pad <= target_rows, keeping >= 2 grid
    steps when possible so both v7x TensorCores get work."""
    divisors = [d for d in range(1, B + 1) if B % d == 0]
    fitting = [d for d in divisors if d * n_pad <= target_rows]
    if not fitting:
        return 1
    bb = max(fitting)
    while bb > 1 and B // bb < 2:
        bb = max(d for d in fitting if d < bb)
    return bb


def vit_attention(x, w_qkv, w_proj, b_proj, *, num_heads,
                  compute_dtype=jnp.bfloat16, target_rows=256):
    """x: (B, N, C); w_qkv: (C, 3C); w_proj: (C, C); b_proj: (1, C).
    target_rows=256 is a good default everywhere; raise to ~512 on v6e."""
    B, N, C = x.shape
    assert C % num_heads == 0
    hd = C // num_heads
    scale = hd ** (-0.5)

    # Fold the softmax scale into the Q columns of W_qkv (loop-invariant).
    # TODO(synk): if qkv_bias=True were used, its Q third must be scaled too.
    w_qkv_eff = w_qkv.at[:, :C].multiply(scale)

    # Pad tokens to a multiple of 8 (sublane tiling); padded keys are masked in
    # the kernel and padded query rows are sliced off below.
    n_pad = max(8, -(-N // 8) * 8)
    if n_pad != N:
        x = jnp.pad(x, ((0, 0), (0, n_pad - N), (0, 0)))

    bb = _choose_batch_block(B, n_pad, target_rows)
    rows = bb * n_pad
    grid = (B // bb,)
    # TODO(synk): for B == 1 the grid has a single step and one v7x TensorCore
    # idles; splitting the query-token axis across the grid would fix that.

    x2 = x.reshape(B * n_pad, C)
    mm_dtype = compute_dtype if compute_dtype is not None else x.dtype

    kernel = functools.partial(
        attention_kernel, num_heads=num_heads, tokens_per_block=n_pad,
        n_valid=N, compute_dtype=compute_dtype)

    H = num_heads
    flops = int(2 * B * n_pad * C * 3 * C               # qkv projection
                + 2 * B * H * n_pad * n_pad * hd * 2    # scores + context
                + 2 * B * n_pad * C * C)                # output projection
    bytes_accessed = int(x2.size * x2.dtype.itemsize
                         + w_qkv.size * w_qkv.dtype.itemsize
                         + w_proj.size * w_proj.dtype.itemsize
                         + b_proj.size * b_proj.dtype.itemsize
                         + B * n_pad * C * x.dtype.itemsize)
    cost = pl.CostEstimate(flops=flops,
                           transcendentals=int(B * H * n_pad * n_pad),
                           bytes_accessed=bytes_accessed)

    def call(weight_pipeline_mode):
        wkw = ({} if weight_pipeline_mode is None
               else dict(pipeline_mode=weight_pipeline_mode))
        return pl.pallas_call(
            kernel,
            out_shape=jax.ShapeDtypeStruct((B * n_pad, C), x.dtype),
            grid=grid,
            in_specs=[
                pl.BlockSpec((rows, C), lambda i: (i, 0)),          # token rows
                pl.BlockSpec((C, 3 * C), lambda i: (0, 0), **wkw),  # qkv weight
                pl.BlockSpec((C, C), lambda i: (0, 0), **wkw),      # proj weight
                pl.BlockSpec((1, C), lambda i: (0, 0), **wkw),      # proj bias
            ],
            out_specs=pl.BlockSpec((rows, C), lambda i: (i, 0)),
            scratch_shapes=[pltpu.VMEM((rows, C), mm_dtype)],       # head concat
            compiler_params=pltpu.CompilerParams(
                dimension_semantics=("parallel",),
                vmem_limit_bytes=48 * 1024 * 1024),
            cost_estimate=cost,
        )(x2, w_qkv_eff, w_proj, b_proj)

    try:
        # Resident weights (constant index_map) only need one VMEM buffer.
        out2 = call(pl.Buffered(1))
    except Exception:
        # Fall back to default double buffering if single-buffering is rejected.
        out2 = call(None)

    return out2.reshape(B, n_pad, C)[:, :N, :]


def reference_attention(x, w_qkv, w_proj, b_proj, *, num_heads):
    """Pure-JAX reference mirroring the PyTorch forward."""
    B, N, C = x.shape
    hd = C // num_heads
    scale = hd ** (-0.5)
    qkv = jnp.einsum('bnc,cd->bnd', x, w_qkv)                 # (B, N, 3C)
    qkv = qkv.reshape(B, N, 3, num_heads, hd).transpose(2, 0, 3, 1, 4)
    q, k, v = qkv[0], qkv[1], qkv[2]                          # (B, H, N, hd)
    attn = jnp.einsum('bhqd,bhkd->bhqk', q, k) * scale
    attn = jax.nn.softmax(attn, axis=-1)
    out = jnp.einsum('bhqk,bhkd->bhqd', attn, v)              # (B, H, N, hd)
    out = out.transpose(0, 2, 1, 3).reshape(B, N, C)
    out = jnp.einsum('bnc,cd->bnd', out, w_proj) + b_proj[0]
    return out


if __name__ == "__main__":
    key = jax.random.PRNGKey(0)

    # --- Test 1: default bf16 compute path, tile-aligned token count ---
    B, N, C, H = 2, 8, 32, 8
    k1, k2, k3, k4, key = jax.random.split(key, 5)
    x = jax.random.normal(k1, (B, N, C), dtype=jnp.float32)
    # qkv_bias=False (module default) -> no qkv bias.
    w_qkv = jax.random.normal(k2, (C, 3 * C), dtype=jnp.float32) * 0.05
    w_proj = jax.random.normal(k3, (C, C), dtype=jnp.float32) * 0.05
    b_proj = jax.random.normal(k4, (1, C), dtype=jnp.float32) * 0.01

    out = jax.block_until_ready(
        vit_attention(x, w_qkv, w_proj, b_proj, num_heads=H))
    ref = reference_attention(x, w_qkv, w_proj, b_proj, num_heads=H)
    assert out.shape == (B, N, C)
    # bf16 MXU inputs (f32 accumulation) -> loosened tolerance.
    assert jnp.allclose(out, ref, atol=2e-2, rtol=2e-2), \
        float(jnp.max(jnp.abs(out - ref)))

    # --- Test 2: f32 compute path + token padding/masking (N=12 -> 16) ---
    B2, N2, C2, H2 = 2, 12, 64, 4
    k1, k2, k3, k4, key = jax.random.split(key, 5)
    x2 = jax.random.normal(k1, (B2, N2, C2), dtype=jnp.float32)
    w_qkv2 = jax.random.normal(k2, (C2, 3 * C2), dtype=jnp.float32) * 0.05
    w_proj2 = jax.random.normal(k3, (C2, C2), dtype=jnp.float32) * 0.05
    b_proj2 = jax.random.normal(k4, (1, C2), dtype=jnp.float32) * 0.01

    out2 = jax.block_until_ready(
        vit_attention(x2, w_qkv2, w_proj2, b_proj2, num_heads=H2,
                      compute_dtype=jnp.float32))
    ref2 = reference_attention(x2, w_qkv2, w_proj2, b_proj2, num_heads=H2)
    assert out2.shape == (B2, N2, C2)
    # f32 path; tolerance only loosened for the EUP approximate reciprocal.
    assert jnp.allclose(out2, ref2, atol=2e-3, rtol=2e-3), \
        float(jnp.max(jnp.abs(out2 - ref2)))

    print("KERNEL_OK")
</pallas_src>

<mosaic_0001>
module attributes {stable_mosaic.version = 11 : i64} {
  func.func @attention_kernel(%arg0: i32, %arg1: memref<8x32xf32, #tpu.memory_space<vmem>>, %arg2: memref<32x96xf32, #tpu.memory_space<vmem>>, %arg3: memref<32x32xf32, #tpu.memory_space<vmem>>, %arg4: memref<1x32xf32, #tpu.memory_space<vmem>>, %arg5: memref<8x32xf32, #tpu.memory_space<vmem>>, %arg6: memref<8x32xbf16, #tpu.memory_space<vmem>>) attributes {dimension_semantics = [#tpu.dimension_semantics<parallel>], iteration_bounds = array<i64: 2>, scalar_prefetch = 0 : i64, scratch_operands = 1 : i64, tpu.core_type = #tpu.core_type<tc>, window_params = [{transform_indices = @transform_0, window_bounds = array<i64: 8, 32>}, {pipeline_mode = #tpu.pipeline_mode<synchronous>, transform_indices = @transform_1, window_bounds = array<i64: 32, 96>}, {pipeline_mode = #tpu.pipeline_mode<synchronous>, transform_indices = @transform_2, window_bounds = array<i64: 32, 32>}, {pipeline_mode = #tpu.pipeline_mode<synchronous>, transform_indices = @transform_3, window_bounds = array<i64: 1, 32>}, {transform_indices = @transform_4, window_bounds = array<i64: 8, 32>}]} {
    %c0 = arith.constant 0 : index
    %c0_0 = arith.constant 0 : index
    %0 = vector.load %arg1[%c0, %c0_0] : memref<8x32xf32, #tpu.memory_space<vmem>>, vector<8x32xf32>
    %c0_1 = arith.constant 0 : index
    %c0_2 = arith.constant 0 : index
    %1 = vector.load %arg2[%c0_1, %c0_2] : memref<32x96xf32, #tpu.memory_space<vmem>>, vector<32x96xf32>
    %c0_3 = arith.constant 0 : index
    %c0_4 = arith.constant 0 : index
    %2 = vector.load %arg3[%c0_3, %c0_4] : memref<32x32xf32, #tpu.memory_space<vmem>>, vector<32x32xf32>
    %3 = arith.truncf %0 : vector<8x32xf32> to vector<8x32xbf16>
    %4 = arith.truncf %1 : vector<32x96xf32> to vector<32x96xbf16>
    %5 = arith.truncf %2 : vector<32x32xf32> to vector<32x32xbf16>
    %cst = arith.constant dense<0.000000e+00> : vector<8x96xf32>
    %6 = tpu.matmul %3, %4, %cst {dimension_numbers = #tpu.dot_dimension_numbers<[1], [0], [0], [1], [0, 0, 1, 1], [], []>} : vector<8x32xbf16>, vector<32x96xbf16>, vector<8x96xf32> -> vector<8x96xf32>
    %7 = vector.extract_strided_slice %6 {offsets = [0, 0], sizes = [8, 32], strides = [1, 1]} : vector<8x96xf32> to vector<8x32xf32>
    %8 = vector.extract_strided_slice %7 {offsets = [0, 0], sizes = [8, 4], strides = [1, 1]} : vector<8x32xf32> to vector<8x4xf32>
    %9 = vector.shape_cast %8 : vector<8x4xf32> to vector<1x8x4xf32>
    %10 = vector.extract_strided_slice %7 {offsets = [0, 4], sizes = [8, 4], strides = [1, 1]} : vector<8x32xf32> to vector<8x4xf32>
    %11 = vector.shape_cast %10 : vector<8x4xf32> to vector<1x8x4xf32>
    %12 = vector.extract_strided_slice %7 {offsets = [0, 8], sizes = [8, 4], strides = [1, 1]} : vector<8x32xf32> to vector<8x4xf32>
    %13 = vector.shape_cast %12 : vector<8x4xf32> to vector<1x8x4xf32>
    %14 = vector.extract_strided_slice %7 {offsets = [0, 12], sizes = [8, 4], strides = [1, 1]} : vector<8x32xf32> to vector<8x4xf32>
    %15 = vector.shape_cast %14 : vector<8x4xf32> to vector<1x8x4xf32>
    %16 = vector.extract_strided_slice %7 {offsets = [0, 16], sizes = [8, 4], strides = [1, 1]} : vector<8x32xf32> to vector<8x4xf32>
    %17 = vector.shape_cast %16 : vector<8x4xf32> to vector<1x8x4xf32>
    %18 = vector.extract_strided_slice %7 {offsets = [0, 20], sizes = [8, 4], strides = [1, 1]} : vector<8x32xf32> to vector<8x4xf32>
    %19 = vector.shape_cast %18 : vector<8x4xf32> to vector<1x8x4xf32>
    %20 = vector.extract_strided_slice %7 {offsets = [0, 24], sizes = [8, 4], strides = [1, 1]} : vector<8x32xf32> to vector<8x4xf32>
    %21 = vector.shape_cast %20 : vector<8x4xf32> to vector<1x8x4xf32>
    %22 = vector.extract_strided_slice %7 {offsets = [0, 28], sizes = [8, 4], strides = [1, 1]} : vector<8x32xf32> to vector<8x4xf32>
    %23 = vector.shape_cast %22 : vector<8x4xf32> to vector<1x8x4xf32>
    %24 = vector.shape_cast %9 : vector<1x8x4xf32> to vector<1x1x8x4xf32>
    %25 = vector.shape_cast %11 : vector<1x8x4xf32> to vector<1x1x8x4xf32>
    %26 = vector.shape_cast %13 : vector<1x8x4xf32> to vector<1x1x8x4xf32>
    %27 = vector.shape_cast %15 : vector<1x8x4xf32> to vector<1x1x8x4xf32>
    %28 = vector.shape_cast %17 : vector<1x8x4xf32> to vector<1x1x8x4xf32>
    %29 = vector.shape_cast %19 : vector<1x8x4xf32> to vector<1x1x8x4xf32>
    %30 = vector.shape_cast %21 : vector<1x8x4xf32> to vector<1x1x8x4xf32>
    %31 = vector.shape_cast %23 : vector<1x8x4xf32> to vector<1x1x8x4xf32>
    %32 = tpu.concatenate %24, %25, %26, %27, %28, %29, %30, %31 in 0 : vector<1x1x8x4xf32>, vector<1x1x8x4xf32>, vector<1x1x8x4xf32>, vector<1x1x8x4xf32>, vector<1x1x8x4xf32>, vector<1x1x8x4xf32>, vector<1x1x8x4xf32>, vector<1x1x8x4xf32> -> vector<8x1x8x4xf32>
    %33 = vector.shape_cast %32 : vector<8x1x8x4xf32> to vector<8x8x4xf32>
    %34 = vector.extract_strided_slice %6 {offsets = [0, 32], sizes = [8, 32], strides = [1, 1]} : vector<8x96xf32> to vector<8x32xf32>
    %35 = vector.extract_strided_slice %34 {offsets = [0, 0], sizes = [8, 4], strides = [1, 1]} : vector<8x32xf32> to vector<8x4xf32>
    %36 = vector.shape_cast %35 : vector<8x4xf32> to vector<1x8x4xf32>
    %37 = vector.extract_strided_slice %34 {offsets = [0, 4], sizes = [8, 4], strides = [1, 1]} : vector<8x32xf32> to vector<8x4xf32>
    %38 = vector.shape_cast %37 : vector<8x4xf32> to vector<1x8x4xf32>
    %39 = vector.extract_strided_slice %34 {offsets = [0, 8], sizes = [8, 4], strides = [1, 1]} : vector<8x32xf32> to vector<8x4xf32>
    %40 = vector.shape_cast %39 : vector<8x4xf32> to vector<1x8x4xf32>
    %41 = vector.extract_strided_slice %34 {offsets = [0, 12], sizes = [8, 4], strides = [1, 1]} : vector<8x32xf32> to vector<8x4xf32>
    %42 = vector.shape_cast %41 : vector<8x4xf32> to vector<1x8x4xf32>
    %43 = vector.extract_strided_slice %34 {offsets = [0, 16], sizes = [8, 4], strides = [1, 1]} : vector<8x32xf32> to vector<8x4xf32>
    %44 = vector.shape_cast %43 : vector<8x4xf32> to vector<1x8x4xf32>
    %45 = vector.extract_strided_slice %34 {offsets = [0, 20], sizes = [8, 4], strides = [1, 1]} : vector<8x32xf32> to vector<8x4xf32>
    %46 = vector.shape_cast %45 : vector<8x4xf32> to vector<1x8x4xf32>
    %47 = vector.extract_strided_slice %34 {offsets = [0, 24], sizes = [8, 4], strides = [1, 1]} : vector<8x32xf32> to vector<8x4xf32>
    %48 = vector.shape_cast %47 : vector<8x4xf32> to vector<1x8x4xf32>
    %49 = vector.extract_strided_slice %34 {offsets = [0, 28], sizes = [8, 4], strides = [1, 1]} : vector<8x32xf32> to vector<8x4xf32>
    %50 = vector.shape_cast %49 : vector<8x4xf32> to vector<1x8x4xf32>
    %51 = vector.shape_cast %36 : vector<1x8x4xf32> to vector<1x1x8x4xf32>
    %52 = vector.shape_cast %38 : vector<1x8x4xf32> to vector<1x1x8x4xf32>
    %53 = vector.shape_cast %40 : vector<1x8x4xf32> to vector<1x1x8x4xf32>
    %54 = vector.shape_cast %42 : vector<1x8x4xf32> to vector<1x1x8x4xf32>
    %55 = vector.shape_cast %44 : vector<1x8x4xf32> to vector<1x1x8x4xf32>
    %56 = vector.shape_cast %46 : vector<1x8x4xf32> to vector<1x1x8x4xf32>
    %57 = vector.shape_cast %48 : vector<1x8x4xf32> to vector<1x1x8x4xf32>
    %58 = vector.shape_cast %50 : vector<1x8x4xf32> to vector<1x1x8x4xf32>
    %59 = tpu.concatenate %51, %52, %53, %54, %55, %56, %57, %58 in 0 : vector<1x1x8x4xf32>, vector<1x1x8x4xf32>, vector<1x1x8x4xf32>, vector<1x1x8x4xf32>, vector<1x1x8x4xf32>, vector<1x1x8x4xf32>, vector<1x1x8x4xf32>, vector<1x1x8x4xf32> -> vector<8x1x8x4xf32>
    %60 = vector.shape_cast %59 : vector<8x1x8x4xf32> to vector<8x8x4xf32>
    %61 = vector.extract_strided_slice %6 {offsets = [0, 64], sizes = [8, 32], strides = [1, 1]} : vector<8x96xf32> to vector<8x32xf32>
    %62 = vector.extract_strided_slice %61 {offsets = [0, 0], sizes = [8, 4], strides = [1, 1]} : vector<8x32xf32> to vector<8x4xf32>
    %63 = vector.shape_cast %62 : vector<8x4xf32> to vector<1x8x4xf32>
    %64 = vector.extract_strided_slice %61 {offsets = [0, 4], sizes = [8, 4], strides = [1, 1]} : vector<8x32xf32> to vector<8x4xf32>
    %65 = vector.shape_cast %64 : vector<8x4xf32> to vector<1x8x4xf32>
    %66 = vector.extract_strided_slice %61 {offsets = [0, 8], sizes = [8, 4], strides = [1, 1]} : vector<8x32xf32> to vector<8x4xf32>
    %67 = vector.shape_cast %66 : vector<8x4xf32> to vector<1x8x4xf32>
    %68 = vector.extract_strided_slice %61 {offsets = [0, 12], sizes = [8, 4], strides = [1, 1]} : vector<8x32xf32> to vector<8x4xf32>
    %69 = vector.shape_cast %68 : vector<8x4xf32> to vector<1x8x4xf32>
    %70 = vector.extract_strided_slice %61 {offsets = [0, 16], sizes = [8, 4], strides = [1, 1]} : vector<8x32xf32> to vector<8x4xf32>
    %71 = vector.shape_cast %70 : vector<8x4xf32> to vector<1x8x4xf32>
    %72 = vector.extract_strided_slice %61 {offsets = [0, 20], sizes = [8, 4], strides = [1, 1]} : vector<8x32xf32> to vector<8x4xf32>
    %73 = vector.shape_cast %72 : vector<8x4xf32> to vector<1x8x4xf32>
    %74 = vector.extract_strided_slice %61 {offsets = [0, 24], sizes = [8, 4], strides = [1, 1]} : vector<8x32xf32> to vector<8x4xf32>
    %75 = vector.shape_cast %74 : vector<8x4xf32> to vector<1x8x4xf32>
    %76 = vector.extract_strided_slice %61 {offsets = [0, 28], sizes = [8, 4], strides = [1, 1]} : vector<8x32xf32> to vector<8x4xf32>
    %77 = vector.shape_cast %76 : vector<8x4xf32> to vector<1x8x4xf32>
    %78 = vector.shape_cast %63 : vector<1x8x4xf32> to vector<1x1x8x4xf32>
    %79 = vector.shape_cast %65 : vector<1x8x4xf32> to vector<1x1x8x4xf32>
    %80 = vector.shape_cast %67 : vector<1x8x4xf32> to vector<1x1x8x4xf32>
    %81 = vector.shape_cast %69 : vector<1x8x4xf32> to vector<1x1x8x4xf32>
    %82 = vector.shape_cast %71 : vector<1x8x4xf32> to vector<1x1x8x4xf32>
    %83 = vector.shape_cast %73 : vector<1x8x4xf32> to vector<1x1x8x4xf32>
    %84 = vector.shape_cast %75 : vector<1x8x4xf32> to vector<1x1x8x4xf32>
    %85 = vector.shape_cast %77 : vector<1x8x4xf32> to vector<1x1x8x4xf32>
    %86 = tpu.concatenate %78, %79, %80, %81, %82, %83, %84, %85 in 0 : vector<1x1x8x4xf32>, vector<1x1x8x4xf32>, vector<1x1x8x4xf32>, vector<1x1x8x4xf32>, vector<1x1x8x4xf32>, vector<1x1x8x4xf32>, vector<1x1x8x4xf32>, vector<1x1x8x4xf32> -> vector<8x1x8x4xf32>
    %87 = vector.shape_cast %86 : vector<8x1x8x4xf32> to vector<8x8x4xf32>
    %88 = arith.truncf %33 : vector<8x8x4xf32> to vector<8x8x4xbf16>
    %89 = arith.truncf %60 : vector<8x8x4xf32> to vector<8x8x4xbf16>
    %90 = arith.truncf %87 : vector<8x8x4xf32> to vector<8x8x4xbf16>
    "tpu.trace_start"() <{level = 10 : i32, message = "bqd,bkd->bqk"}> : () -> ()
    %cst_5 = arith.constant dense<0.000000e+00> : vector<8x8x8xf32>
    %91 = tpu.matmul %88, %89, %cst_5 {dimension_numbers = #tpu.dot_dimension_numbers<[2], [2], [1], [1], [0, 0, 0, 1, 1, 1], [0], [0]>} : vector<8x8x4xbf16>, vector<8x8x4xbf16>, vector<8x8x8xf32> -> vector<8x8x8xf32>
    "tpu.trace_stop"() : () -> ()
    %cst_6 = arith.constant dense<0xFF800000> : vector<8x8xf32>
    %92 = vector.multi_reduction <maximumf>, %91, %cst_6 [2] : vector<8x8x8xf32> to vector<8x8xf32>
    %93 = vector.shape_cast %92 : vector<8x8xf32> to vector<8x8x1xf32>
    %94 = vector.broadcast %93 : vector<8x8x1xf32> to vector<8x8x8xf32>
    %95 = arith.subf %91, %94 : vector<8x8x8xf32>
    %96 = math.exp %95 : vector<8x8x8xf32>
    %cst_7 = arith.constant dense<0.000000e+00> : vector<8x8xf32>
    %97 = vector.multi_reduction <add>, %96, %cst_7 [2] : vector<8x8x8xf32> to vector<8x8xf32>
    %98 = vector.shape_cast %97 : vector<8x8xf32> to vector<8x8x1xf32>
    %99 = tpu.reciprocal %98 {approx = true} : vector<8x8x1xf32> -> vector<8x8x1xf32>
    %100 = vector.broadcast %99 : vector<8x8x1xf32> to vector<8x8x8xf32>
    %101 = arith.mulf %96, %100 : vector<8x8x8xf32>
    %102 = arith.truncf %101 : vector<8x8x8xf32> to vector<8x8x8xbf16>
    "tpu.trace_start"() <{level = 10 : i32, message = "bqk,bkd->bqd"}> : () -> ()
    %cst_8 = arith.constant dense<0.000000e+00> : vector<8x8x4xf32>
    %103 = tpu.matmul %102, %90, %cst_8 {dimension_numbers = #tpu.dot_dimension_numbers<[2], [1], [1], [2], [0, 0, 0, 1, 1, 2], [0], [0]>} : vector<8x8x8xbf16>, vector<8x8x4xbf16>, vector<8x8x4xf32> -> vector<8x8x4xf32>
    "tpu.trace_stop"() : () -> ()
    %104 = vector.extract_strided_slice %103 {offsets = [0, 0, 0], sizes = [1, 8, 4], strides = [1, 1, 1]} : vector<8x8x4xf32> to vector<1x8x4xf32>
    %105 = vector.shape_cast %104 : vector<1x8x4xf32> to vector<8x4xf32>
    %106 = arith.truncf %105 : vector<8x4xf32> to vector<8x4xbf16>
    %c0_9 = arith.constant 0 : index
    %c0_10 = arith.constant 0 : index
    %107 = vector.load %arg6[%c0_9, %c0_10] : memref<8x32xbf16, #tpu.memory_space<vmem>>, vector<8x4xbf16>
    tpu.vector_store %arg6[%c0_9, %c0_10], %106 {strides = array<i32>} : memref<8x32xbf16, #tpu.memory_space<vmem>>, vector<8x4xbf16>,
    %108 = vector.extract_strided_slice %103 {offsets = [1, 0, 0], sizes = [1, 8, 4], strides = [1, 1, 1]} : vector<8x8x4xf32> to vector<1x8x4xf32>
    %109 = vector.shape_cast %108 : vector<1x8x4xf32> to vector<8x4xf32>
    %110 = arith.truncf %109 : vector<8x4xf32> to vector<8x4xbf16>
    %c0_11 = arith.constant 0 : index
    %c4 = arith.constant 4 : index
    %111 = vector.load %arg6[%c0_11, %c4] : memref<8x32xbf16, #tpu.memory_space<vmem>>, vector<8x4xbf16>
    tpu.vector_store %arg6[%c0_11, %c4], %110 {strides = array<i32>} : memref<8x32xbf16, #tpu.memory_space<vmem>>, vector<8x4xbf16>,
    %112 = vector.extract_strided_slice %103 {offsets = [2, 0, 0], sizes = [1, 8, 4], strides = [1, 1, 1]} : vector<8x8x4xf32> to vector<1x8x4xf32>
    %113 = vector.shape_cast %112 : vector<1x8x4xf32> to vector<8x4xf32>
    %114 = arith.truncf %113 : vector<8x4xf32> to vector<8x4xbf16>
    %c0_12 = arith.constant 0 : index
    %c8 = arith.constant 8 : index
    %115 = vector.load %arg6[%c0_12, %c8] : memref<8x32xbf16, #tpu.memory_space<vmem>>, vector<8x4xbf16>
    tpu.vector_store %arg6[%c0_12, %c8], %114 {strides = array<i32>} : memref<8x32xbf16, #tpu.memory_space<vmem>>, vector<8x4xbf16>,
    %116 = vector.extract_strided_slice %103 {offsets = [3, 0, 0], sizes = [1, 8, 4], strides = [1, 1, 1]} : vector<8x8x4xf32> to vector<1x8x4xf32>
    %117 = vector.shape_cast %116 : vector<1x8x4xf32> to vector<8x4xf32>
    %118 = arith.truncf %117 : vector<8x4xf32> to vector<8x4xbf16>
    %c0_13 = arith.constant 0 : index
    %c12 = arith.constant 12 : index
    %119 = vector.load %arg6[%c0_13, %c12] : memref<8x32xbf16, #tpu.memory_space<vmem>>, vector<8x4xbf16>
    tpu.vector_store %arg6[%c0_13, %c12], %118 {strides = array<i32>} : memref<8x32xbf16, #tpu.memory_space<vmem>>, vector<8x4xbf16>,
    %120 = vector.extract_strided_slice %103 {offsets = [4, 0, 0], sizes = [1, 8, 4], strides = [1, 1, 1]} : vector<8x8x4xf32> to vector<1x8x4xf32>
    %121 = vector.shape_cast %120 : vector<1x8x4xf32> to vector<8x4xf32>
    %122 = arith.truncf %121 : vector<8x4xf32> to vector<8x4xbf16>
    %c0_14 = arith.constant 0 : index
    %c16 = arith.constant 16 : index
    %123 = vector.load %arg6[%c0_14, %c16] : memref<8x32xbf16, #tpu.memory_space<vmem>>, vector<8x4xbf16>
    tpu.vector_store %arg6[%c0_14, %c16], %122 {strides = array<i32>} : memref<8x32xbf16, #tpu.memory_space<vmem>>, vector<8x4xbf16>,
    %124 = vector.extract_strided_slice %103 {offsets = [5, 0, 0], sizes = [1, 8, 4], strides = [1, 1, 1]} : vector<8x8x4xf32> to vector<1x8x4xf32>
    %125 = vector.shape_cast %124 : vector<1x8x4xf32> to vector<8x4xf32>
    %126 = arith.truncf %125 : vector<8x4xf32> to vector<8x4xbf16>
    %c0_15 = arith.constant 0 : index
    %c20 = arith.constant 20 : index
    %127 = vector.load %arg6[%c0_15, %c20] : memref<8x32xbf16, #tpu.memory_space<vmem>>, vector<8x4xbf16>
    tpu.vector_store %arg6[%c0_15, %c20], %126 {strides = array<i32>} : memref<8x32xbf16, #tpu.memory_space<vmem>>, vector<8x4xbf16>,
    %128 = vector.extract_strided_slice %103 {offsets = [6, 0, 0], sizes = [1, 8, 4], strides = [1, 1, 1]} : vector<8x8x4xf32> to vector<1x8x4xf32>
    %129 = vector.shape_cast %128 : vector<1x8x4xf32> to vector<8x4xf32>
    %130 = arith.truncf %129 : vector<8x4xf32> to vector<8x4xbf16>
    %c0_16 = arith.constant 0 : index
    %c24 = arith.constant 24 : index
    %131 = vector.load %arg6[%c0_16, %c24] : memref<8x32xbf16, #tpu.memory_space<vmem>>, vector<8x4xbf16>
    tpu.vector_store %arg6[%c0_16, %c24], %130 {strides = array<i32>} : memref<8x32xbf16, #tpu.memory_space<vmem>>, vector<8x4xbf16>,
    %132 = vector.extract_strided_slice %103 {offsets = [7, 0, 0], sizes = [1, 8, 4], strides = [1, 1, 1]} : vector<8x8x4xf32> to vector<1x8x4xf32>
    %133 = vector.shape_cast %132 : vector<1x8x4xf32> to vector<8x4xf32>
    %134 = arith.truncf %133 : vector<8x4xf32> to vector<8x4xbf16>
    %c0_17 = arith.constant 0 : index
    %c28 = arith.constant 28 : index
    %135 = vector.load %arg6[%c0_17, %c28] : memref<8x32xbf16, #tpu.memory_space<vmem>>, vector<8x4xbf16>
    tpu.vector_store %arg6[%c0_17, %c28], %134 {strides = array<i32>} : memref<8x32xbf16, #tpu.memory_space<vmem>>, vector<8x4xbf16>,
    %c0_18 = arith.constant 0 : index
    %c0_19 = arith.constant 0 : index
    %136 = vector.load %arg6[%c0_18, %c0_19] : memref<8x32xbf16, #tpu.memory_space<vmem>>, vector<8x32xbf16>
    %cst_20 = arith.constant dense<0.000000e+00> : vector<8x32xf32>
    %137 = tpu.matmul %136, %5, %cst_20 {dimension_numbers = #tpu.dot_dimension_numbers<[1], [0], [0], [1], [0, 0, 1, 1], [], []>} : vector<8x32xbf16>, vector<32x32xbf16>, vector<8x32xf32> -> vector<8x32xf32>
    %c0_21 = arith.constant 0 : index
    %c0_22 = arith.constant 0 : index
    %138 = vector.load %arg4[%c0_21, %c0_22] : memref<1x32xf32, #tpu.memory_space<vmem>>, vector<1x32xf32>
    %139 = vector.broadcast %138 : vector<1x32xf32> to vector<8x32xf32>
    %140 = arith.addf %137, %139 : vector<8x32xf32>
    %c0_23 = arith.constant 0 : index
    %c0_24 = arith.constant 0 : index
    %141 = vector.load %arg5[%c0_23, %c0_24] : memref<8x32xf32, #tpu.memory_space<vmem>>, vector<8x32xf32>
    tpu.vector_store %arg5[%c0_23, %c0_24], %140 {strides = array<i32>} : memref<8x32xf32, #tpu.memory_space<vmem>>, vector<8x32xf32>,
    return
  }
  func.func @transform_0(%arg0: i32) -> (i32, i32) {
    %c0_i32 = arith.constant 0 : i32
    %c0_i32_0 = arith.constant 0 : i32
    return %arg0, %c0_i32 : i32, i32
  }
  func.func @transform_1(%arg0: i32) -> (i32, i32) {
    %c0_i32 = arith.constant 0 : i32
    %c0_i32_0 = arith.constant 0 : i32
    %c0_i32_1 = arith.constant 0 : i32
    return %c0_i32, %c0_i32_0 : i32, i32
  }
  func.func @transform_2(%arg0: i32) -> (i32, i32) {
    %c0_i32 = arith.constant 0 : i32
    %c0_i32_0 = arith.constant 0 : i32
    %c0_i32_1 = arith.constant 0 : i32
    return %c0_i32, %c0_i32_0 : i32, i32
  }
  func.func @transform_3(%arg0: i32) -> (i32, i32) {
    %c0_i32 = arith.constant 0 : i32
    %c0_i32_0 = arith.constant 0 : i32
    %c0_i32_1 = arith.constant 0 : i32
    return %c0_i32, %c0_i32_0 : i32, i32
  }
  func.func @transform_4(%arg0: i32) -> (i32, i32) {
    %c0_i32 = arith.constant 0 : i32
    %c0_i32_0 = arith.constant 0 : i32
    return %arg0, %c0_i32 : i32, i32
  }
}

module attributes {stable_mosaic.version = 11 : i64} {
  func.func @attention_kernel(%arg0: i32, %arg1: memref<8x32xf32, #tpu.memory_space<vmem>>, %arg2: memref<32x96xf32, #tpu.memory_space<vmem>>, %arg3: memref<32x32xf32, #tpu.memory_space<vmem>>, %arg4: memref<1x32xf32, #tpu.memory_space<vmem>>, %arg5: memref<8x32xf32, #tpu.memory_space<vmem>>, %arg6: memref<8x32xbf16, #tpu.memory_space<vmem>>) attributes {dimension_semantics = [#tpu.dimension_semantics<parallel>], iteration_bounds = array<i64: 2>, scalar_prefetch = 0 : i64, scratch_operands = 1 : i64, tpu.core_type = #tpu.core_type<tc>, window_params = [{transform_indices = @transform_0, window_bounds = array<i64: 8, 32>}, {pipeline_mode = #tpu.pipeline_mode<synchronous>, transform_indices = @transform_1, window_bounds = array<i64: 32, 96>}, {pipeline_mode = #tpu.pipeline_mode<synchronous>, transform_indices = @transform_2, window_bounds = array<i64: 32, 32>}, {pipeline_mode = #tpu.pipeline_mode<synchronous>, transform_indices = @transform_3, window_bounds = array<i64: 1, 32>}, {transform_indices = @transform_4, window_bounds = array<i64: 8, 32>}]} {
    %c0 = arith.constant 0 : index
    %c0_0 = arith.constant 0 : index
    %0 = vector.load %arg1[%c0, %c0_0] : memref<8x32xf32, #tpu.memory_space<vmem>>, vector<8x32xf32>
    %c0_1 = arith.constant 0 : index
    %c0_2 = arith.constant 0 : index
    %1 = vector.load %arg2[%c0_1, %c0_2] : memref<32x96xf32, #tpu.memory_space<vmem>>, vector<32x96xf32>
    %c0_3 = arith.constant 0 : index
    %c0_4 = arith.constant 0 : index
    %2 = vector.load %arg3[%c0_3, %c0_4] : memref<32x32xf32, #tpu.memory_space<vmem>>, vector<32x32xf32>
    %3 = arith.truncf %0 : vector<8x32xf32> to vector<8x32xbf16>
    %4 = arith.truncf %1 : vector<32x96xf32> to vector<32x96xbf16>
    %5 = arith.truncf %2 : vector<32x32xf32> to vector<32x32xbf16>
    %cst = arith.constant dense<0.000000e+00> : vector<8x96xf32>
    %6 = tpu.matmul %3, %4, %cst {dimension_numbers = #tpu.dot_dimension_numbers<[1], [0], [0], [1], [0, 0, 1, 1], [], []>} : vector<8x32xbf16>, vector<32x96xbf16>, vector<8x96xf32> -> vector<8x96xf32>
    %7 = vector.extract_strided_slice %6 {offsets = [0, 0], sizes = [8, 32], strides = [1, 1]} : vector<8x96xf32> to vector<8x32xf32>
    %8 = vector.extract_strided_slice %7 {offsets = [0, 0], sizes = [8, 4], strides = [1, 1]} : vector<8x32xf32> to vector<8x4xf32>
    %9 = vector.shape_cast %8 : vector<8x4xf32> to vector<1x8x4xf32>
    %10 = vector.extract_strided_slice %7 {offsets = [0, 4], sizes = [8, 4], strides = [1, 1]} : vector<8x32xf32> to vector<8x4xf32>
    %11 = vector.shape_cast %10 : vector<8x4xf32> to vector<1x8x4xf32>
    %12 = vector.extract_strided_slice %7 {offsets = [0, 8], sizes = [8, 4], strides = [1, 1]} : vector<8x32xf32> to vector<8x4xf32>
    %13 = vector.shape_cast %12 : vector<8x4xf32> to vector<1x8x4xf32>
    %14 = vector.extract_strided_slice %7 {offsets = [0, 12], sizes = [8, 4], strides = [1, 1]} : vector<8x32xf32> to vector<8x4xf32>
    %15 = vector.shape_cast %14 : vector<8x4xf32> to vector<1x8x4xf32>
    %16 = vector.extract_strided_slice %7 {offsets = [0, 16], sizes = [8, 4], strides = [1, 1]} : vector<8x32xf32> to vector<8x4xf32>
    %17 = vector.shape_cast %16 : vector<8x4xf32> to vector<1x8x4xf32>
    %18 = vector.extract_strided_slice %7 {offsets = [0, 20], sizes = [8, 4], strides = [1, 1]} : vector<8x32xf32> to vector<8x4xf32>
    %19 = vector.shape_cast %18 : vector<8x4xf32> to vector<1x8x4xf32>
    %20 = vector.extract_strided_slice %7 {offsets = [0, 24], sizes = [8, 4], strides = [1, 1]} : vector<8x32xf32> to vector<8x4xf32>
    %21 = vector.shape_cast %20 : vector<8x4xf32> to vector<1x8x4xf32>
    %22 = vector.extract_strided_slice %7 {offsets = [0, 28], sizes = [8, 4], strides = [1, 1]} : vector<8x32xf32> to vector<8x4xf32>
    %23 = vector.shape_cast %22 : vector<8x4xf32> to vector<1x8x4xf32>
    %24 = vector.shape_cast %9 : vector<1x8x4xf32> to vector<1x1x8x4xf32>
    %25 = vector.shape_cast %11 : vector<1x8x4xf32> to vector<1x1x8x4xf32>
    %26 = vector.shape_cast %13 : vector<1x8x4xf32> to vector<1x1x8x4xf32>
    %27 = vector.shape_cast %15 : vector<1x8x4xf32> to vector<1x1x8x4xf32>
    %28 = vector.shape_cast %17 : vector<1x8x4xf32> to vector<1x1x8x4xf32>
    %29 = vector.shape_cast %19 : vector<1x8x4xf32> to vector<1x1x8x4xf32>
    %30 = vector.shape_cast %21 : vector<1x8x4xf32> to vector<1x1x8x4xf32>
    %31 = vector.shape_cast %23 : vector<1x8x4xf32> to vector<1x1x8x4xf32>
    %32 = tpu.concatenate %24, %25, %26, %27, %28, %29, %30, %31 in 0 : vector<1x1x8x4xf32>, vector<1x1x8x4xf32>, vector<1x1x8x4xf32>, vector<1x1x8x4xf32>, vector<1x1x8x4xf32>, vector<1x1x8x4xf32>, vector<1x1x8x4xf32>, vector<1x1x8x4xf32> -> vector<8x1x8x4xf32>
    %33 = vector.shape_cast %32 : vector<8x1x8x4xf32> to vector<8x8x4xf32>
    %34 = vector.extract_strided_slice %6 {offsets = [0, 32], sizes = [8, 32], strides = [1, 1]} : vector<8x96xf32> to vector<8x32xf32>
    %35 = vector.extract_strided_slice %34 {offsets = [0, 0], sizes = [8, 4], strides = [1, 1]} : vector<8x32xf32> to vector<8x4xf32>
    %36 = vector.shape_cast %35 : vector<8x4xf32> to vector<1x8x4xf32>
    %37 = vector.extract_strided_slice %34 {offsets = [0, 4], sizes = [8, 4], strides = [1, 1]} : vector<8x32xf32> to vector<8x4xf32>
    %38 = vector.shape_cast %37 : vector<8x4xf32> to vector<1x8x4xf32>
    %39 = vector.extract_strided_slice %34 {offsets = [0, 8], sizes = [8, 4], strides = [1, 1]} : vector<8x32xf32> to vector<8x4xf32>
    %40 = vector.shape_cast %39 : vector<8x4xf32> to vector<1x8x4xf32>
    %41 = vector.extract_strided_slice %34 {offsets = [0, 12], sizes = [8, 4], strides = [1, 1]} : vector<8x32xf32> to vector<8x4xf32>
    %42 = vector.shape_cast %41 : vector<8x4xf32> to vector<1x8x4xf32>
    %43 = vector.extract_strided_slice %34 {offsets = [0, 16], sizes = [8, 4], strides = [1, 1]} : vector<8x32xf32> to vector<8x4xf32>
    %44 = vector.shape_cast %43 : vector<8x4xf32> to vector<1x8x4xf32>
    %45 = vector.extract_strided_slice %34 {offsets = [0, 20], sizes = [8, 4], strides = [1, 1]} : vector<8x32xf32> to vector<8x4xf32>
    %46 = vector.shape_cast %45 : vector<8x4xf32> to vector<1x8x4xf32>
    %47 = vector.extract_strided_slice %34 {offsets = [0, 24], sizes = [8, 4], strides = [1, 1]} : vector<8x32xf32> to vector<8x4xf32>
    %48 = vector.shape_cast %47 : vector<8x4xf32> to vector<1x8x4xf32>
    %49 = vector.extract_strided_slice %34 {offsets = [0, 28], sizes = [8, 4], strides = [1, 1]} : vector<8x32xf32> to vector<8x4xf32>
    %50 = vector.shape_cast %49 : vector<8x4xf32> to vector<1x8x4xf32>
    %51 = vector.shape_cast %36 : vector<1x8x4xf32> to vector<1x1x8x4xf32>
    %52 = vector.shape_cast %38 : vector<1x8x4xf32> to vector<1x1x8x4xf32>
    %53 = vector.shape_cast %40 : vector<1x8x4xf32> to vector<1x1x8x4xf32>
    %54 = vector.shape_cast %42 : vector<1x8x4xf32> to vector<1x1x8x4xf32>
    %55 = vector.shape_cast %44 : vector<1x8x4xf32> to vector<1x1x8x4xf32>
    %56 = vector.shape_cast %46 : vector<1x8x4xf32> to vector<1x1x8x4xf32>
    %57 = vector.shape_cast %48 : vector<1x8x4xf32> to vector<1x1x8x4xf32>
    %58 = vector.shape_cast %50 : vector<1x8x4xf32> to vector<1x1x8x4xf32>
    %59 = tpu.concatenate %51, %52, %53, %54, %55, %56, %57, %58 in 0 : vector<1x1x8x4xf32>, vector<1x1x8x4xf32>, vector<1x1x8x4xf32>, vector<1x1x8x4xf32>, vector<1x1x8x4xf32>, vector<1x1x8x4xf32>, vector<1x1x8x4xf32>, vector<1x1x8x4xf32> -> vector<8x1x8x4xf32>
    %60 = vector.shape_cast %59 : vector<8x1x8x4xf32> to vector<8x8x4xf32>
    %61 = vector.extract_strided_slice %6 {offsets = [0, 64], sizes = [8, 32], strides = [1, 1]} : vector<8x96xf32> to vector<8x32xf32>
    %62 = vector.extract_strided_slice %61 {offsets = [0, 0], sizes = [8, 4], strides = [1, 1]} : vector<8x32xf32> to vector<8x4xf32>
    %63 = vector.shape_cast %62 : vector<8x4xf32> to vector<1x8x4xf32>
    %64 = vector.extract_strided_slice %61 {offsets = [0, 4], sizes = [8, 4], strides = [1, 1]} : vector<8x32xf32> to vector<8x4xf32>
    %65 = vector.shape_cast %64 : vector<8x4xf32> to vector<1x8x4xf32>
    %66 = vector.extract_strided_slice %61 {offsets = [0, 8], sizes = [8, 4], strides = [1, 1]} : vector<8x32xf32> to vector<8x4xf32>
    %67 = vector.shape_cast %66 : vector<8x4xf32> to vector<1x8x4xf32>
    %68 = vector.extract_strided_slice %61 {offsets = [0, 12], sizes = [8, 4], strides = [1, 1]} : vector<8x32xf32> to vector<8x4xf32>
    %69 = vector.shape_cast %68 : vector<8x4xf32> to vector<1x8x4xf32>
    %70 = vector.extract_strided_slice %61 {offsets = [0, 16], sizes = [8, 4], strides = [1, 1]} : vector<8x32xf32> to vector<8x4xf32>
    %71 = vector.shape_cast %70 : vector<8x4xf32> to vector<1x8x4xf32>
    %72 = vector.extract_strided_slice %61 {offsets = [0, 20], sizes = [8, 4], strides = [1, 1]} : vector<8x32xf32> to vector<8x4xf32>
    %73 = vector.shape_cast %72 : vector<8x4xf32> to vector<1x8x4xf32>
    %74 = vector.extract_strided_slice %61 {offsets = [0, 24], sizes = [8, 4], strides = [1, 1]} : vector<8x32xf32> to vector<8x4xf32>
    %75 = vector.shape_cast %74 : vector<8x4xf32> to vector<1x8x4xf32>
    %76 = vector.extract_strided_slice %61 {offsets = [0, 28], sizes = [8, 4], strides = [1, 1]} : vector<8x32xf32> to vector<8x4xf32>
    %77 = vector.shape_cast %76 : vector<8x4xf32> to vector<1x8x4xf32>
    %78 = vector.shape_cast %63 : vector<1x8x4xf32> to vector<1x1x8x4xf32>
    %79 = vector.shape_cast %65 : vector<1x8x4xf32> to vector<1x1x8x4xf32>
    %80 = vector.shape_cast %67 : vector<1x8x4xf32> to vector<1x1x8x4xf32>
    %81 = vector.shape_cast %69 : vector<1x8x4xf32> to vector<1x1x8x4xf32>
    %82 = vector.shape_cast %71 : vector<1x8x4xf32> to vector<1x1x8x4xf32>
    %83 = vector.shape_cast %73 : vector<1x8x4xf32> to vector<1x1x8x4xf32>
    %84 = vector.shape_cast %75 : vector<1x8x4xf32> to vector<1x1x8x4xf32>
    %85 = vector.shape_cast %77 : vector<1x8x4xf32> to vector<1x1x8x4xf32>
    %86 = tpu.concatenate %78, %79, %80, %81, %82, %83, %84, %85 in 0 : vector<1x1x8x4xf32>, vector<1x1x8x4xf32>, vector<1x1x8x4xf32>, vector<1x1x8x4xf32>, vector<1x1x8x4xf32>, vector<1x1x8x4xf32>, vector<1x1x8x4xf32>, vector<1x1x8x4xf32> -> vector<8x1x8x4xf32>
    %87 = vector.shape_cast %86 : vector<8x1x8x4xf32> to vector<8x8x4xf32>
    %88 = arith.truncf %33 : vector<8x8x4xf32> to vector<8x8x4xbf16>
    %89 = arith.truncf %60 : vector<8x8x4xf32> to vector<8x8x4xbf16>
    %90 = arith.truncf %87 : vector<8x8x4xf32> to vector<8x8x4xbf16>
    "tpu.trace_start"() <{level = 10 : i32, message = "bqd,bkd->bqk"}> : () -> ()
    %cst_5 = arith.constant dense<0.000000e+00> : vector<8x8x8xf32>
    %91 = tpu.matmul %88, %89, %cst_5 {dimension_numbers = #tpu.dot_dimension_numbers<[2], [2], [1], [1], [0, 0, 0, 1, 1, 1], [0], [0]>} : vector<8x8x4xbf16>, vector<8x8x4xbf16>, vector<8x8x8xf32> -> vector<8x8x8xf32>
    "tpu.trace_stop"() : () -> ()
    %cst_6 = arith.constant dense<0xFF800000> : vector<8x8xf32>
    %92 = vector.multi_reduction <maximumf>, %91, %cst_6 [2] : vector<8x8x8xf32> to vector<8x8xf32>
    %93 = vector.shape_cast %92 : vector<8x8xf32> to vector<8x8x1xf32>
    %94 = vector.broadcast %93 : vector<8x8x1xf32> to vector<8x8x8xf32>
    %95 = arith.subf %91, %94 : vector<8x8x8xf32>
    %96 = math.exp %95 : vector<8x8x8xf32>
    %cst_7 = arith.constant dense<0.000000e+00> : vector<8x8xf32>
    %97 = vector.multi_reduction <add>, %96, %cst_7 [2] : vector<8x8x8xf32> to vector<8x8xf32>
    %98 = vector.shape_cast %97 : vector<8x8xf32> to vector<8x8x1xf32>
    %99 = tpu.reciprocal %98 {approx = true} : vector<8x8x1xf32> -> vector<8x8x1xf32>
    %100 = vector.broadcast %99 : vector<8x8x1xf32> to vector<8x8x8xf32>
    %101 = arith.mulf %96, %100 : vector<8x8x8xf32>
    %102 = arith.truncf %101 : vector<8x8x8xf32> to vector<8x8x8xbf16>
    "tpu.trace_start"() <{level = 10 : i32, message = "bqk,bkd->bqd"}> : () -> ()
    %cst_8 = arith.constant dense<0.000000e+00> : vector<8x8x4xf32>
    %103 = tpu.matmul %102, %90, %cst_8 {dimension_numbers = #tpu.dot_dimension_numbers<[2], [1], [1], [2], [0, 0, 0, 1, 1, 2], [0], [0]>} : vector<8x8x8xbf16>, vector<8x8x4xbf16>, vector<8x8x4xf32> -> vector<8x8x4xf32>
    "tpu.trace_stop"() : () -> ()
    %104 = vector.extract_strided_slice %103 {offsets = [0, 0, 0], sizes = [1, 8, 4], strides = [1, 1, 1]} : vector<8x8x4xf32> to vector<1x8x4xf32>
    %105 = vector.shape_cast %104 : vector<1x8x4xf32> to vector<8x4xf32>
    %106 = arith.truncf %105 : vector<8x4xf32> to vector<8x4xbf16>
    %c0_9 = arith.constant 0 : index
    %c0_10 = arith.constant 0 : index
    %107 = vector.load %arg6[%c0_9, %c0_10] : memref<8x32xbf16, #tpu.memory_space<vmem>>, vector<8x4xbf16>
    tpu.vector_store %arg6[%c0_9, %c0_10], %106 {strides = array<i32>} : memref<8x32xbf16, #tpu.memory_space<vmem>>, vector<8x4xbf16>,
    %108 = vector.extract_strided_slice %103 {offsets = [1, 0, 0], sizes = [1, 8, 4], strides = [1, 1, 1]} : vector<8x8x4xf32> to vector<1x8x4xf32>
    %109 = vector.shape_cast %108 : vector<1x8x4xf32> to vector<8x4xf32>
    %110 = arith.truncf %109 : vector<8x4xf32> to vector<8x4xbf16>
    %c0_11 = arith.constant 0 : index
    %c4 = arith.constant 4 : index
    %111 = vector.load %arg6[%c0_11, %c4] : memref<8x32xbf16, #tpu.memory_space<vmem>>, vector<8x4xbf16>
    tpu.vector_store %arg6[%c0_11, %c4], %110 {strides = array<i32>} : memref<8x32xbf16, #tpu.memory_space<vmem>>, vector<8x4xbf16>,
    %112 = vector.extract_strided_slice %103 {offsets = [2, 0, 0], sizes = [1, 8, 4], strides = [1, 1, 1]} : vector<8x8x4xf32> to vector<1x8x4xf32>
    %113 = vector.shape_cast %112 : vector<1x8x4xf32> to vector<8x4xf32>
    %114 = arith.truncf %113 : vector<8x4xf32> to vector<8x4xbf16>
    %c0_12 = arith.constant 0 : index
    %c8 = arith.constant 8 : index
    %115 = vector.load %arg6[%c0_12, %c8] : memref<8x32xbf16, #tpu.memory_space<vmem>>, vector<8x4xbf16>
    tpu.vector_store %arg6[%c0_12, %c8], %114 {strides = array<i32>} : memref<8x32xbf16, #tpu.memory_space<vmem>>, vector<8x4xbf16>,
    %116 = vector.extract_strided_slice %103 {offsets = [3, 0, 0], sizes = [1, 8, 4], strides = [1, 1, 1]} : vector<8x8x4xf32> to vector<1x8x4xf32>
    %117 = vector.shape_cast %116 : vector<1x8x4xf32> to vector<8x4xf32>
    %118 = arith.truncf %117 : vector<8x4xf32> to vector<8x4xbf16>
    %c0_13 = arith.constant 0 : index
    %c12 = arith.constant 12 : index
    %119 = vector.load %arg6[%c0_13, %c12] : memref<8x32xbf16, #tpu.memory_space<vmem>>, vector<8x4xbf16>
    tpu.vector_store %arg6[%c0_13, %c12], %118 {strides = array<i32>} : memref<8x32xbf16, #tpu.memory_space<vmem>>, vector<8x4xbf16>,
    %120 = vector.extract_strided_slice %103 {offsets = [4, 0, 0], sizes = [1, 8, 4], strides = [1, 1, 1]} : vector<8x8x4xf32> to vector<1x8x4xf32>
    %121 = vector.shape_cast %120 : vector<1x8x4xf32> to vector<8x4xf32>
    %122 = arith.truncf %121 : vector<8x4xf32> to vector<8x4xbf16>
    %c0_14 = arith.constant 0 : index
    %c16 = arith.constant 16 : index
    %123 = vector.load %arg6[%c0_14, %c16] : memref<8x32xbf16, #tpu.memory_space<vmem>>, vector<8x4xbf16>
    tpu.vector_store %arg6[%c0_14, %c16], %122 {strides = array<i32>} : memref<8x32xbf16, #tpu.memory_space<vmem>>, vector<8x4xbf16>,
    %124 = vector.extract_strided_slice %103 {offsets = [5, 0, 0], sizes = [1, 8, 4], strides = [1, 1, 1]} : vector<8x8x4xf32> to vector<1x8x4xf32>
    %125 = vector.shape_cast %124 : vector<1x8x4xf32> to vector<8x4xf32>
    %126 = arith.truncf %125 : vector<8x4xf32> to vector<8x4xbf16>
    %c0_15 = arith.constant 0 : index
    %c20 = arith.constant 20 : index
    %127 = vector.load %arg6[%c0_15, %c20] : memref<8x32xbf16, #tpu.memory_space<vmem>>, vector<8x4xbf16>
    tpu.vector_store %arg6[%c0_15, %c20], %126 {strides = array<i32>} : memref<8x32xbf16, #tpu.memory_space<vmem>>, vector<8x4xbf16>,
    %128 = vector.extract_strided_slice %103 {offsets = [6, 0, 0], sizes = [1, 8, 4], strides = [1, 1, 1]} : vector<8x8x4xf32> to vector<1x8x4xf32>
    %129 = vector.shape_cast %128 : vector<1x8x4xf32> to vector<8x4xf32>
    %130 = arith.truncf %129 : vector<8x4xf32> to vector<8x4xbf16>
    %c0_16 = arith.constant 0 : index
    %c24 = arith.constant 24 : index
    %131 = vector.load %arg6[%c0_16, %c24] : memref<8x32xbf16, #tpu.memory_space<vmem>>, vector<8x4xbf16>
    tpu.vector_store %arg6[%c0_16, %c24], %130 {strides = array<i32>} : memref<8x32xbf16, #tpu.memory_space<vmem>>, vector<8x4xbf16>,
    %132 = vector.extract_strided_slice %103 {offsets = [7, 0, 0], sizes = [1, 8, 4], strides = [1, 1, 1]} : vector<8x8x4xf32> to vector<1x8x4xf32>
    %133 = vector.shape_cast %132 : vector<1x8x4xf32> to vector<8x4xf32>
    %134 = arith.truncf %133 : vector<8x4xf32> to vector<8x4xbf16>
    %c0_17 = arith.constant 0 : index
    %c28 = arith.constant 28 : index
    %135 = vector.load %arg6[%c0_17, %c28] : memref<8x32xbf16, #tpu.memory_space<vmem>>, vector<8x4xbf16>
    tpu.vector_store %arg6[%c0_17, %c28], %134 {strides = array<i32>} : memref<8x32xbf16, #tpu.memory_space<vmem>>, vector<8x4xbf16>,
    %c0_18 = arith.constant 0 : index
    %c0_19 = arith.constant 0 : index
    %136 = vector.load %arg6[%c0_18, %c0_19] : memref<8x32xbf16, #tpu.memory_space<vmem>>, vector<8x32xbf16>
    %cst_20 = arith.constant dense<0.000000e+00> : vector<8x32xf32>
    %137 = tpu.matmul %136, %5, %cst_20 {dimension_numbers = #tpu.dot_dimension_numbers<[1], [0], [0], [1], [0, 0, 1, 1], [], []>} : vector<8x32xbf16>, vector<32x32xbf16>, vector<8x32xf32> -> vector<8x32xf32>
    %c0_21 = arith.constant 0 : index
    %c0_22 = arith.constant 0 : index
    %138 = vector.load %arg4[%c0_21, %c0_22] : memref<1x32xf32, #tpu.memory_space<vmem>>, vector<1x32xf32>
    %139 = vector.broadcast %138 : vector<1x32xf32> to vector<8x32xf32>
    %140 = arith.addf %137, %139 : vector<8x32xf32>
    %c0_23 = arith.constant 0 : index
    %c0_24 = arith.constant 0 : index
    %141 = vector.load %arg5[%c0_23, %c0_24] : memref<8x32xf32, #tpu.memory_space<vmem>>, vector<8x32xf32>
    tpu.vector_store %arg5[%c0_23, %c0_24], %140 {strides = array<i32>} : memref<8x32xf32, #tpu.memory_space<vmem>>, vector<8x32xf32>,
    return
  }
  func.func @transform_0(%arg0: i32) -> (i32, i32) {
    %c0_i32 = arith.constant 0 : i32
    %c0_i32_0 = arith.constant 0 : i32
    return %arg0, %c0_i32 : i32, i32
  }
  func.func @transform_1(%arg0: i32) -> (i32, i32) {
    %c0_i32 = arith.constant 0 : i32
    %c0_i32_0 = arith.constant 0 : i32
    %c0_i32_1 = arith.constant 0 : i32
    return %c0_i32, %c0_i32_0 : i32, i32
  }
  func.func @transform_2(%arg0: i32) -> (i32, i32) {
    %c0_i32 = arith.constant 0 : i32
    %c0_i32_0 = arith.constant 0 : i32
    %c0_i32_1 = arith.constant 0 : i32
    return %c0_i32, %c0_i32_0 : i32, i32
  }
  func.func @transform_3(%arg0: i32) -> (i32, i32) {
    %c0_i32 = arith.constant 0 : i32
    %c0_i32_0 = arith.constant 0 : i32
    %c0_i32_1 = arith.constant 0 : i32
    return %c0_i32, %c0_i32_0 : i32, i32
  }
  func.func @transform_4(%arg0: i32) -> (i32, i32) {
    %c0_i32 = arith.constant 0 : i32
    %c0_i32_0 = arith.constant 0 : i32
    return %arg0, %c0_i32 : i32, i32
  }
}

</mosaic_0001>

<bundles_post_ra>
// kernel: tpu_custom_call.1
= control target key start
LH: loop header
LB: loop body
LE: loop exit
PB: predicated region body
PF: predicated region fallthrough
CT: control target
= control target key end

     0   :  { %9 = vsyncpa [#allocation4], 0  ;;  %s2383_s0 = inlined_call_operand.hbm [shape: f32[16,32], index: 0, kind: input, shape index: {}]   ;;  %s2384_s1 = inlined_call_operand.hbm [shape: f32[32,96], index: 1, kind: input, shape index: {}]   ;;  %s2385_s2 = inlined_call_operand.hbm [shape: f32[32,32], index: 2, kind: input, shape index: {}]   ;;  %s2386_s3 = inlined_call_operand.vmem [shape: f32[1,32], index: 3, kind: input, shape index: {}]   ;;  %s2387_s4 = inlined_call_operand.hbm [shape: f32[16,32], index: 4, kind: output, shape index: {}]  }
   0x1   :  { %11 = vsyncpa [#allocation4 + $0x1], 0 }
   0x2   :  { %12 = vsyncpa [#allocation7], 0 }
   0x3   :  { %13 = vsyncpa [#allocation5], 0 }
   0x4   :  { %15 = vsyncpa [#allocation5 + $0x1], 0  ;;  %s1952_s15 = smov 0   ;;  %s1954_s16 = smov 0  }
   0x5   :  { %s1956_s17 = smov 0   ;;  %s1958_s18 = smov 0  }
   0x6 LB: > { %s1973_s19 = sadd.s32 4294967295, %s1901_s18   ;;  %s1427_s20 = sadd.s32 4294967294, %s1901_s18   ;;  %s1901_s18 = sphi %s1958_s18, %s2407_s18   ;;  %s1897_s17 = sphi %s1956_s17, %s2406_s17   ;;  %s1893_s16 = sphi %s1954_s16, %s2405_s16   ;;  %s1889_s15 = sphi %s1952_s15, %s2404_s15  }
   0x7   : > { %p41_p0 = scmp.ne.s32.totalorder %s1893_s16, %s1889_s15  ;;  %p2388_p1 = scmp.eq.s32.totalorder %s1973_s19, 0 }
   0x8   : > { %p134_p3 = scmp.eq.s32.totalorder %s1427_s20, 1  ;;  %p1428_p5 = scmp.ge.s32.totalorder %s1901_s18, 1 }
   0x9   : > { %p1982_p4 = por %p2388_p1, %p41_p0  ;;  %p141_p7 = scmp.lt.s32.totalorder %s1901_s18, 3 }
   0xa   : > { %p1987_p6 = por %p134_p3, %p41_p0  ;;  %s1903_s24 = smov [#allocation6]  }
   0xb   : > { %s2391_s21 = scalar_select %p1982_p4, 1, 0 }
   0xc   : > { %s2392_s22 = scalar_select %p1987_p6, 1, 0 }
   0xd   : > { %p1992_p8 = pnand %p1428_p5, %p141_p7  ;;  %s153_s25 = sshll.u32 %s1903_s24, 4  ;;  %s1996_s25 = int_to_ptr.vmem [resolvable:$true] %s153_s25 }
   0xe   : > { %s1904_s27 = smov [#allocation8]   ;;  %s1745_s5 = scalar_lea.hbm %s2384_s1, 512 }
   0xf   : > { %p1638_p9 = pneg %p1992_p8  ;;  %s166_s28 = sshll.u32 %s1904_s27, 4  ;;  %s2007_s28 = int_to_ptr.vmem [resolvable:$true] %s166_s28 }
  0x10   : > { %p1746_p12 = scmp.ne.s32.totalorder %s2384_s1, %s1745_s5  ;;  %p1752_p5 = scmp.lt.u32.totalorder %s1745_s5, %s2384_s1 }
  0x11   : > { %p2003_p11 = pnand %p1638_p9, %p2388_p1 }
  0x13   : > { %p1747_p13 = pneg %p2003_p11 }
  0x15   : > { %p1748_p0 = pnand %p1747_p13, %p1746_p12 }
  0x17   : > { %p1749_p3 = pneg %p1748_p0 }
  0x19   : > { %p1754_p7 = pnand %p1752_p5, %p1749_p3 }
  0x1b   : > { %1757 = shalt.err (!%p1754_p7)
}
  0x1c   : > { %s1758_s10 = scalar_lea.vmem %s1996_s25, 512  ;;  %p1766_p2 = scmp.lt.s32.totalorder %s1996_s25, %s1996_s25 }
  0x1d   : > { %p1759_p9 = scmp.ne.s32.totalorder %s1996_s25, %s1758_s10  ;;  %p1767_p12 = scmp.lt.s32.totalorder %s1758_s10, %s1758_s10 }
  0x1f   : > { %p1761_p10 = pnand %p1759_p9, %p1747_p13  ;;  %p1768_p0 = por %p1767_p12, %p1766_p2 }
  0x21   : > { %p1762_p1 = pneg %p1761_p10 }
  0x23   : > { %p1769_p6 = pnand %p1768_p0, %p1762_p1 }
  0x25   : > { %1772 = shalt.err (!%p1769_p6)
}
  0x26   : > { %s1905_s11 = smov 128   ;;  %s1906_s12 = smov 8  }
  0x27   : > { %1641 = dma.hbm_to_vmem [thread:$0]  (!%p2003_p11), %s2384_s1, 512, %s1996_s25, [#allocation7], %s1905_s11, %s1905_s11, %s1906_s12  }
  0x28   : > { %s1773_s27 = scalar_lea.hbm %s2385_s2, 512 }
  0x29   : > { %p1774_p2 = scmp.ne.s32.totalorder %s2385_s2, %s1773_s27  ;;  %p1780_p10 = scmp.lt.u32.totalorder %s1773_s27, %s2385_s2 }
  0x2b   : > { %p1776_p1 = pnand %p1774_p2, %p1747_p13 }
  0x2d   : > { %p1777_p6 = pneg %p1776_p1 }
  0x2f   : > { %p1782_p3 = pnand %p1780_p10, %p1777_p6 }
  0x31   : > { %1785 = shalt.err (!%p1782_p3)
}
  0x32   : > { %s1786_s25 = scalar_lea.vmem %s2007_s28, 512  ;;  %p1794_p12 = scmp.lt.s32.totalorder %s2007_s28, %s2007_s28 }
  0x33   : > { %p1787_p5 = scmp.ne.s32.totalorder %s2007_s28, %s1786_s25  ;;  %p1795_p0 = scmp.lt.s32.totalorder %s1786_s25, %s1786_s25 }
  0x35   : > { %p1789_p7 = pnand %p1787_p5, %p1747_p13  ;;  %p1796_p2 = por %p1795_p0, %p1794_p12 }
  0x37   : > { %p1790_p9 = pneg %p1789_p7 }
  0x39   : > { %p1797_p1 = pnand %p1796_p2, %p1790_p9 }
  0x3b   : > { %1800 = shalt.err (!%p1797_p1)
}
  0x3c   : > { %1644 = dma.hbm_to_vmem [thread:$0]  (!%p2003_p11), %s2385_s2, 512, %s2007_s28, [#allocation7], %s1905_s11, %s1905_s11, %s1906_s12  }
  0x3d   : > { %s2062_s9 = sadd.s32 1, %s1901_s18   ;;  %s28_s26 = sadd.s32 1, %s1897_s17 }
  0x3e   : > { %s25_s10 = ssub.s32 %s1901_s18, %s2062_s9  ;;  %p35_p13 = scmp.ne.s32.totalorder %s1897_s17, %s1893_s16 }
  0x3f   : > { %p26_p6 = scmp.eq.s32.totalorder %s25_s10, 0  ;;  %p36_p10 = scmp.eq.s32.totalorder %s1901_s18, 0 }
  0x40   : > { %p2395_p3 = scmp.eq.s32.totalorder %s1973_s19, 1  ;;  %p1655_p7 = scmp.lt.s32.totalorder %s1901_s18, 2 }
  0x41   : > { %s2078_s14 = scalar_select %p26_p6, %s1897_s17, %s28_s26  }
  0x42   : > { %p2072_p5 = por %p2395_p3, %p35_p13  ;;  %p37_p9 = por %p36_p10, %p35_p13 }
  0x43   : > { %s183_s20 = sand.u32 1, %s1897_s17   ;;  %s1433_s28 = sshll.u32 %s1901_s18, 7 }
  0x44   : > { %s2396_s13 = scalar_select %p2072_p5, 1, 0 }
  0x45   : > { %s1432_s24 = sshll.u32 %s183_s20, 3  ;;  %s2085_s27 = scalar_lea.hbm %s2383_s0, %s1433_s28 }
  0x46   : > { %s187_s29 = scalar_lea.vmem [#allocation3], %s1432_s24  ;;  %p2089_p11 = pnand %p1655_p7, %p37_p9 }
  0x47   : > { %s194_s30 = sshll.u32 %s187_s29, 4  ;;  %s184_s6 = scalar_lea.sflag [#allocation4], %s183_s20  ;;  %s2087_s30 = int_to_ptr.vmem [resolvable:$true] %s194_s30 }
  0x48   : > { %s1801_s25 = scalar_lea.hbm %s2085_s27, 128  ;;  %p1803_p0 = pneg %p2089_p11 }
  0x49   : > { %p1802_p12 = scmp.ne.s32.totalorder %s2085_s27, %s1801_s25  ;;  %s1806_s26 = scalar_lea.hbm %s2383_s0, 256 }
  0x4a   : > { %p1807_p13 = scmp.lt.u32.totalorder %s2085_s27, %s2383_s0  ;;  %p1808_p6 = scmp.lt.u32.totalorder %s1806_s26, %s1801_s25 }
  0x4b   : > { %p1804_p2 = pnand %p1803_p0, %p1802_p12  ;;  %p1810_p3 = scmp.lt.u32.totalorder %s1801_s25, %s2085_s27 }
  0x4c   : > { %p1809_p10 = por %p1808_p6, %p1807_p13 }
  0x4d   : > { %p1805_p1 = pneg %p1804_p2 }
  0x4e   : > { %p1811_p7 = por %p1810_p3, %p1809_p10 }
  0x50   : > { %p1812_p9 = pnand %p1811_p7, %p1805_p1 }
  0x52   : > { %1815 = shalt.err (!%p1812_p9)
}
  0x53   : > { %s1816_s20 = scalar_lea.vmem %s2087_s30, 128  ;;  %s1907_s28 = smov [#allocation3]  }
  0x54   : > { %p1817_p12 = scmp.ne.s32.totalorder %s2087_s30, %s1816_s20  ;;  %s1821_s11 = sshll.u32 %s1907_s28, 4  ;;  %s1822_s11 = int_to_ptr.vmem [resolvable:$false] %s1821_s11 }
  0x55   : > { %s1823_s12 = scalar_lea.vmem %s1822_s11, 256  ;;  %p1824_p4 = scmp.lt.s32.totalorder %s2087_s30, %s1822_s11 }
  0x56   : > { %p1819_p2 = pnand %p1817_p12, %p1803_p0  ;;  %p1825_p13 = scmp.lt.s32.totalorder %s1823_s12, %s1816_s20 }
  0x58   : > { %p1820_p5 = pneg %p1819_p2  ;;  %p1826_p6 = por %p1825_p13, %p1824_p4 }
  0x5a   : > { %p1827_p10 = pnand %p1826_p6, %p1820_p5 }
  0x5c   : > { %1830 = shalt.err (!%p1827_p10)
}
  0x5d   : > { %1648 = dma.hbm_to_vmem [thread:$0]  (!%p2089_p11), %s2085_s27, 128, %s2087_s30, %s184_s6  }
  0x5e   : > { %203 = sbr.rel (%p1992_p8) target bundleno = 1726 (0x6be), region = 36  ;;  %s2121_s29 = sand.u32 (!%p1992_p8), 1, %s1893_s16  }
  0x5f   : > { %s1435_s25 = sshll.u32 (!%p1992_p8), %s2121_s29, 3  ;;  %s206_s7 = scalar_lea.sflag (!%p1992_p8), [#allocation4], %s2121_s29 }
  0x60   : > { %s209_s8 = scalar_lea.vmem (!%p1992_p8), [#allocation3], %s1435_s25  ;;  %p2398_p4 = scmp.ne.s32.totalorder (!%p1992_p8), %s2391_s21, 0 }
  0x65   : > { %1876 = dma.done.wait (%p2398_p4), %s206_s7, 128  }
  0x66   : > { %1878 = vsyncadd (%p2398_p4), %s206_s7, 4294967168  ;;  %p2399_p5 = scmp.eq.s32.totalorder %s1973_s19, 0 }
  0x68   : > { %1880 = dma.done.wait (%p2399_p5), [#allocation7], 1024   ;;  %p2400_p8 = pmov %p2399_p5 }
  0x69   : > { %v1908_v0 = vmov 0.0   ;;  %vm1909_vm0 = vmmov 0   ;;  %v244_v1 = vld [vmem:[#allocation6] sm:$0xff]  ;;  %v245_v2 = vld [vmem:[#allocation6 + $0x8] sm:$0xff]  ;;  %v246_v3 = vld [vmem:[#allocation6 + $0x10] sm:$0xff]  ;;  %vm257_vm1 = vcmask 261120  }
  0x6a   : > { %1882 = vsyncadd (%p2400_p8), [#allocation7], 4294966272  ;;  %1514 = vmatprep.subr.bf16.mxu0 %v1908_v0  ;;  %1518 = vmatprep.mubr.msk.bf16.mxu0 %vm1909_vm0, %v1908_v0  ;;  %v253_v4 = vpack.c.bf16 %v245_v2, %v244_v1  ;;  %v247_v5 = vld [vmem:[#allocation6 + $0x18] sm:$0xff]  ;;  %s1910_s21 = smov 116   ;;  %s1911_s23 = smov 124   ;;  %vm334_vm2 = vcmask 31744  }
  0x6b   : > { %1522 = vmatprep.subr.bf16.mxu1 %v1908_v0  ;;  %1524 = vmatprep.mubr.msk.bf16.mxu1 %vm1909_vm0, %v1908_v0  ;;  %v254_v6 = vpack.c.bf16 %v247_v5, %v246_v3  ;;  %v243_v7 = vld [vmem:[%s209_s8] sm:$0xff]  ;;  %s1912_s27 = smov 112   ;;  %s1913_s30 = smov 120   ;;  %vm724_vm3 = vcmask 64512   ;;  %vm826_vm4 = vcmask 1043456   ;;  %vm1207_vm5 = vcmask 27648  }
  0x6c   : > { %1515 = vmatpush3.bf16.msra.mxu0 %v253_v4  ;;  %v252_v8 = vpack.c.bf16 %v243_v7, %v243_v7  ;;  %s1914_s5 = smov 104   ;;  %s1915_s6 = smov 108   ;;  %vm1216_vm6 = vcmask 60448   ;;  %vm1225_vm7 = vcmask 93248   ;;  %vm1234_vm8 = vcmask 126048  }
  0x6d   : > { %1516 = vmatprep.subr.bf16.mxu0 %v1908_v0  ;;  %s1916_s26 = smov 100   ;;  %s1917_s10 = smov 96   ;;  %vm1243_vm9 = vcmask 158848   ;;  %vm1252_vm10 = vcmask 191648   ;;  %vm1261_vm11 = vcmask 224448   ;;  %vm1270_vm12 = vcmask 257248  }
  0x6e   : > { %s1918_s24 = smov 64   ;;  %s1919_s20 = smov 4  }
  0x6f   : > { %s1920_s28 = smov 8   ;;  %s1921_s11 = smov 12  }
  0x70   : > { %1517 = vmatpush3.bf16.msra.mxu0 %v254_v6  ;;  %s1922_s12 = smov 20   ;;  %s1923_s7 = smov 28  }
  0x71   : > { %1528 = vmatprep.subr.bf16.mxu0 %v1908_v0  ;;  %s1924_s8 = smov 16   ;;  %p2401_p0 = scmp.ne.s32.totalorder %s2396_s13, 0 }
  0x73   : > { %1519 = vmatmul.mubr.msk.bf16.vlgmr.msra.gmra.mrb[0].mxu0 %vm257_vm1, %v252_v8 }
  0x74   : > { %1530 = vmatprep.mubr.msk.bf16.mxu0 %vm1909_vm0, %v1908_v0 }
 0x146   : > { %v295_v9 = vpop.f32.mrb[0].mxu0 }
 0x147   : > { %308 = vrot.lane.b32.xlu1 %v295_v9, %s1910_s21  ;;  %302 = vrot.lane.b32.xlu0 %v295_v9, %s1911_s23  ;;  %v1520_v10 = vpop.f32.mrb[1].mxu0  ;;  %v2146_v13 = vpack.c.bf16 %v295_v9, %v295_v9  ;;  %s1925_s21 = smov 24  }
 0x148   : > { %v298_v11 = vpop.f32.mrb[2].mxu0 }
 0x149   : > { %v1521_v12 = vpop.f32.mrb[3].mxu0 }
 0x14b   : > { %311 = vrot.lane.b32.xlu1 %v295_v9, %s1912_s27  ;;  %305 = vrot.lane.b32.xlu0 %v295_v9, %s1913_s30  ;;  %s1466_s30 = sshll.u32 %s1973_s19, 7  ;;  %s1325_s19 = scalar_lea.sflag [#allocation5], %s2121_s29 }
 0x14f   : > { %317 = vrot.lane.b32.xlu1 %v295_v9, %s1914_s5  ;;  %314 = vrot.lane.b32.xlu0 %v295_v9, %s1915_s6  ;;  %s241_s5 = scalar_lea.vmem [#allocation9], %s1435_s25 }
 0x150   : > { %s1338_s6 = sshll.u32 %s241_s5, 4  ;;  %s2340_s6 = int_to_ptr.vmem [resolvable:$true] %s1338_s6 }
 0x151   : > { %s1831_s25 = scalar_lea.vmem %s2340_s6, 128 }
 0x152   : > { %p1832_p11 = scmp.ne.s32.totalorder %s2340_s6, %s1831_s25 }
 0x153   : > { %320 = vrot.lane.b32.xlu0 %v295_v9, %s1916_s26  ;;  %332 = vrot.lane.b32.xlu1 %v2146_v13, %s1917_s10 }
 0x154   : > { %p1833_p1 = pnand %p1832_p11, %p2401_p0 }
 0x156   : > { %p1834_p3 = pneg %p1833_p1 }
 0x1b9   : > { %v309_v14 = vpop.permute.xlu1 %308  ;;  %v303_v15 = vpop.permute.xlu0 %302 }
 0x1ba   : > { %v2149_v16 = vpack.c.bf16 %v303_v15, %v303_v15  ;;  %v2152_v19 = vpack.c.bf16 %v309_v14, %v309_v14 }
 0x1bc   : > { %382 = vrot.lane.b32.xlu0 %v2149_v16, %s1917_s10 }
 0x1bd   : > { %v312_v17 = vpop.permute.xlu1 %311  ;;  %v306_v18 = vpop.permute.xlu0 %305 }
 0x1be   : > { %v2154_v20 = vpack.c.bf16 %v306_v18, %v306_v18  ;;  %v2158_v23 = vpack.c.bf16 %v312_v17, %v312_v17 }
 0x1c0   : > { %480 = vrot.lane.b32.xlu0 %v2152_v19, %s1917_s10  ;;  %431 = vrot.lane.b32.xlu1 %v2154_v20, %s1917_s10 }
 0x1c1   : > { %v318_v21 = vpop.permute.xlu1 %317  ;;  %v315_v22 = vpop.permute.xlu0 %314 }
 0x1c2   : > { %v2160_v24 = vpack.c.bf16 %v315_v22, %v315_v22  ;;  %v2164_v27 = vpack.c.bf16 %v318_v21, %v318_v21 }
 0x1c4   : > { %578 = vrot.lane.b32.xlu0 %v2160_v24, %s1917_s10  ;;  %529 = vrot.lane.b32.xlu1 %v2158_v23, %s1917_s10 }
 0x1c5   : > { %v321_v25 = vpop.permute.xlu0 %320  ;;  %v333_v26 = vpop.permute.xlu1 %332 }
 0x1c6   : > { %v2166_v28 = vpack.c.bf16 %v321_v25, %v321_v25  ;;  %v339_v29 = vsel %vm334_vm2, %v333_v26, 0 }
 0x1c7   : > { %1523 = vmatpush3.bf16.xpose.msra.mxu1 %v339_v29 }
 0x1c8   : > { %676 = vrot.lane.b32.xlu0 %v2166_v28, %s1917_s10  ;;  %627 = vrot.lane.b32.xlu1 %v2164_v27, %s1917_s10 }
 0x1c9   : > { %1534 = vmatprep.subr.bf16.mxu1 %v1908_v0 }
 0x1ce   : > { %1525 = vmatmul.mubr.msk.bf16.vlgmr.msra.gmra.mrb[0].mxu1 %vm334_vm2, %v2146_v13 }
 0x1cf   : > { %1536 = vmatprep.mubr.msk.bf16.mxu1 %vm1909_vm0, %v1908_v0 }
 0x22e   : > { %v383_v30 = vpop.permute.xlu0 %382 }
 0x22f   : > { %v388_v31 = vsel %vm334_vm2, %v383_v30, 0 }
 0x230   : > { %1529 = vmatpush3.bf16.xpose.msra.mxu0 %v388_v31 }
 0x231   : > { %1540 = vmatprep.subr.bf16.mxu0 %v1908_v0 }
 0x232   : > { %v432_v32 = vpop.permute.xlu1 %431  ;;  %v481_v34 = vpop.permute.xlu0 %480 }
 0x233   : > { %v437_v33 = vsel %vm334_vm2, %v432_v32, 0  ;;  %v486_v35 = vsel %vm334_vm2, %v481_v34, 0 }
 0x234   : > { %1535 = vmatpush3.bf16.xpose.msra.mxu1 %v437_v33 }
 0x235   : > { %1546 = vmatprep.subr.bf16.mxu1 %v1908_v0 }
 0x236   : > { %v530_v36 = vpop.permute.xlu1 %529  ;;  %v579_v38 = vpop.permute.xlu0 %578 }
 0x237   : > { %1531 = vmatmul.mubr.msk.bf16.vlgmr.msra.gmra.mrb[4].mxu0 %vm334_vm2, %v2149_v16  ;;  %v535_v37 = vsel %vm334_vm2, %v530_v36, 0  ;;  %v584_v39 = vsel %vm334_vm2, %v579_v38, 0 }
 0x238   : > { %1541 = vmatpush3.bf16.xpose.msra.mxu0 %v486_v35  ;;  %1542 = vmatprep.mubr.msk.bf16.mxu0 %vm1909_vm0, %v1908_v0 }
 0x239   : > { %1552 = vmatprep.subr.bf16.mxu0 %v1908_v0 }
 0x23a   : > { %v628_v40 = vpop.permute.xlu1 %627  ;;  %v677_v42 = vpop.permute.xlu0 %676 }
 0x23b   : > { %1537 = vmatmul.mubr.msk.bf16.vlgmr.msra.gmra.mrb[4].mxu1 %vm334_vm2, %v2154_v20  ;;  %v633_v41 = vsel %vm334_vm2, %v628_v40, 0  ;;  %v682_v43 = vsel %vm334_vm2, %v677_v42, 0 }
 0x23c   : > { %1547 = vmatpush3.bf16.xpose.msra.mxu1 %v535_v37  ;;  %1548 = vmatprep.mubr.msk.bf16.mxu1 %vm1909_vm0, %v1908_v0 }
 0x23d   : > { %1558 = vmatprep.subr.bf16.mxu1 %v1908_v0 }
 0x23f   : > { %1543 = vmatmul.mubr.msk.bf16.vlgmr.msra.gmra.mrb[8].mxu0 %vm334_vm2, %v2152_v19 }
 0x240   : > { %1553 = vmatpush3.bf16.xpose.msra.mxu0 %v584_v39  ;;  %1554 = vmatprep.mubr.msk.bf16.mxu0 %vm1909_vm0, %v1908_v0 }
 0x241   : > { %1564 = vmatprep.subr.bf16.mxu0 %v1908_v0 }
 0x243   : > { %1549 = vmatmul.mubr.msk.bf16.vlgmr.msra.gmra.mrb[8].mxu1 %vm334_vm2, %v2158_v23 }
 0x244   : > { %1559 = vmatpush3.bf16.xpose.msra.mxu1 %v633_v41  ;;  %1560 = vmatprep.mubr.msk.bf16.mxu1 %vm1909_vm0, %v1908_v0 }
 0x245   : > { %1570 = vmatprep.subr.bf16.mxu1 %v1908_v0 }
 0x247   : > { %1555 = vmatmul.mubr.msk.bf16.vlgmr.msra.gmra.mrb[12].mxu0 %vm334_vm2, %v2160_v24 }
 0x248   : > { %1565 = vmatpush3.bf16.xpose.msra.mxu0 %v682_v43  ;;  %1566 = vmatprep.mubr.msk.bf16.mxu0 %vm1909_vm0, %v1908_v0 }
 0x249   : > { %1576 = vmatprep.subr.bf16.mxu0 %v1908_v0 }
 0x24b   : > { %1561 = vmatmul.mubr.msk.bf16.vlgmr.msra.gmra.mrb[12].mxu1 %vm334_vm2, %v2164_v27 }
 0x24c   : > { %1572 = vmatprep.mubr.msk.bf16.mxu1 %vm1909_vm0, %v1908_v0 }
 0x24f   : > { %1567 = vmatmul.mubr.msk.bf16.vlgmr.msra.gmra.mrb[16].mxu0 %vm334_vm2, %v2166_v28 }
 0x250   : > { %1578 = vmatprep.mubr.msk.bf16.mxu0 %vm1909_vm0, %v1908_v0 }
 0x2a1   : > { %v375_v44 = vpop.f32.mrb[0].mxu1 }
 0x2a2   : > { %v1526_v45 = vpop.f32.mrb[1].mxu1  ;;  %v725_v46 = vsel %vm724_vm3, %v375_v44, -inf }
 0x2a3   : > { %726 = vmax.xlane.f32.xlu1 %v725_v46  ;;  %v378_v47 = vpop.f32.mrb[2].mxu1 }
 0x2a4   : > { %v1527_v48 = vpop.f32.mrb[3].mxu1 }
 0x30a   : > { %v424_v49 = vpop.f32.mrb[4].mxu0 }
 0x30b   : > { %v1532_v50 = vpop.f32.mrb[5].mxu0  ;;  %v728_v51 = vsel %vm724_vm3, %v424_v49, -inf }
 0x30c   : > { %729 = vmax.xlane.f32.xlu0 %v728_v51  ;;  %v427_v52 = vpop.f32.mrb[6].mxu0 }
 0x30d   : > { %v1533_v53 = vpop.f32.mrb[7].mxu0 }
 0x30e   : > { %v473_v54 = vpop.f32.mrb[4].mxu1 }
 0x30f   : > { %v1538_v55 = vpop.f32.mrb[5].mxu1  ;;  %v731_v56 = vsel %vm724_vm3, %v473_v54, -inf }
 0x310   : > { %v476_v57 = vpop.f32.mrb[6].mxu1  ;;  %732 = vmax.xlane.f32.xlu0 %v731_v56 }
 0x311   : > { %v1539_v58 = vpop.f32.mrb[7].mxu1 }
 0x312   : > { %v522_v59 = vpop.f32.mrb[8].mxu0 }
 0x313   : > { %v1544_v60 = vpop.f32.mrb[9].mxu0  ;;  %v734_v61 = vsel %vm724_vm3, %v522_v59, -inf }
 0x314   : > { %735 = vmax.xlane.f32.xlu1 %v734_v61  ;;  %v525_v62 = vpop.f32.mrb[10].mxu0 }
 0x315   : > { %v1545_v63 = vpop.f32.mrb[11].mxu0 }
 0x316   : > { %v2222_v1 = vpop.f32.mrb[8].mxu1 }
 0x317   : > { %v1550_v2 = vpop.f32.mrb[9].mxu1  ;;  %v737_v3 = vsel %vm724_vm3, %v2222_v1, -inf }
 0x318   : > { %v574_v4 = vpop.f32.mrb[10].mxu1  ;;  %738 = vmax.xlane.f32.xlu0 %v737_v3 }
 0x319   : > { %v1551_v5 = vpop.f32.mrb[11].mxu1 }
 0x31a   : > { %v620_v6 = vpop.f32.mrb[12].mxu0 }
 0x31b   : > { %v1556_v7 = vpop.f32.mrb[13].mxu0  ;;  %v740_v8 = vsel %vm724_vm3, %v620_v6, -inf }
 0x31c   : > { %741 = vmax.xlane.f32.xlu1 %v740_v8  ;;  %v623_v9 = vpop.f32.mrb[14].mxu0 }
 0x31d   : > { %v1557_v10 = vpop.f32.mrb[15].mxu0 }
 0x31e   : > { %v2227_v11 = vpop.f32.mrb[12].mxu1 }
 0x31f   : > { %v1562_v12 = vpop.f32.mrb[13].mxu1  ;;  %v743_v14 = vsel %vm724_vm3, %v2227_v11, -inf }
 0x320   : > { %v672_v15 = vpop.f32.mrb[14].mxu1  ;;  %744 = vmax.xlane.f32.xlu0 %v743_v14 }
 0x321   : > { %v1563_v17 = vpop.f32.mrb[15].mxu1 }
 0x322   : > { %v718_v18 = vpop.f32.mrb[16].mxu0 }
 0x323   : > { %v1568_v21 = vpop.f32.mrb[17].mxu0  ;;  %v746_v22 = vsel %vm724_vm3, %v718_v18, -inf }
 0x324   : > { %747 = vmax.xlane.f32.xlu1 %v746_v22  ;;  %v721_v25 = vpop.f32.mrb[18].mxu0 }
 0x325   : > { %v1569_v26 = vpop.f32.mrb[19].mxu0 }
 0x330   : > { %v727_v29 = vpop.xlane.xlu1 %726 }
 0x331   : > { %v749_v30 = vsub.f32 %v375_v44, %v727_v29 }
 0x333   : > { %v757_v31 = vmul.f32 1.442695, %v749_v30 }
 0x335   : > { %870 = vrot.lane.b32.xlu1 %v2149_v16, %s1918_s24  ;;  %1713 = vpow2.f32 %v757_v31 }
 0x336   : > { %821 = vrot.lane.b32.xlu0 %v2146_v13, %s1918_s24 }
 0x339   : > { %918 = vrot.lane.b32.xlu1 %v2154_v20, %s1918_s24 }
 0x33a   : > { %966 = vrot.lane.b32.xlu0 %v2152_v19, %s1918_s24 }
 0x33d   : > { %1014 = vrot.lane.b32.xlu1 %v2158_v23, %s1918_s24 }
 0x33f   : > { %v2242_v32 = vpop.eup %1713 }
 0x340   : > { %v773_v16 = vsel %vm724_vm3, %v2242_v32, 0.0 }
 0x359   : > { %774 = vadd.xlane.f32.xlu0 %v773_v16 }
 0x399   : > { %v730_v13 = vpop.xlane.xlu0 %729 }
 0x39a   : > { %v750_v33 = vsub.f32 %v424_v49, %v730_v13 }
 0x39c   : > { %v759_v34 = vmul.f32 1.442695, %v750_v33 }
 0x39d   : > { %v733_v20 = vpop.xlane.xlu0 %732 }
 0x39e   : > { %1715 = vpow2.f32 %v759_v34  ;;  %v751_v35 = vsub.f32 %v473_v54, %v733_v20 }
 0x3a0   : > { %v761_v19 = vmul.f32 1.442695, %v751_v35 }
 0x3a1   : > { %v736_v36 = vpop.xlane.xlu1 %735 }
 0x3a2   : > { %1717 = vpow2.f32 %v761_v19  ;;  %v752_v23 = vsub.f32 %v522_v59, %v736_v36 }
 0x3a4   : > { %v763_v37 = vmul.f32 1.442695, %v752_v23 }
 0x3a5   : > { %v739_v39 = vpop.xlane.xlu0 %738 }
 0x3a6   : > { %1719 = vpow2.f32 %v763_v37  ;;  %v753_v60 = vsub.f32 %v2222_v1, %v739_v39 }
 0x3a8   : > { %v2246_v38 = vpop.eup %1715  ;;  %v765_v61 = vmul.f32 1.442695, %v753_v60 }
 0x3a9   : > { %v742_v40 = vpop.xlane.xlu1 %741  ;;  %v776_v41 = vsel %vm724_vm3, %v2246_v38, 0.0 }
 0x3aa   : > { %v754_v42 = vsub.f32 %v620_v6, %v742_v40  ;;  %777 = vadd.xlane.f32.xlu1 %v776_v41 }
 0x3ac   : > { %v2250_v43 = vpop.eup %1717  ;;  %v767_v44 = vmul.f32 1.442695, %v754_v42 }
 0x3ad   : > { %v745_v45 = vpop.xlane.xlu0 %744  ;;  %v779_v46 = vsel %vm724_vm3, %v2250_v43, 0.0 }
 0x3ae   : > { %1721 = vpow2.f32 %v767_v44  ;;  %780 = vadd.xlane.f32.xlu0 %v779_v46  ;;  %v755_v62 = vsub.f32 %v2227_v11, %v745_v45 }
 0x3b0   : > { %v2254_v47 = vpop.eup %1719  ;;  %v769_v63 = vmul.f32 1.442695, %v755_v62 }
 0x3b1   : > { %v822_v48 = vpop.permute.xlu0 %821  ;;  %v748_v49 = vpop.xlane.xlu1 %747  ;;  %v782_v50 = vsel %vm724_vm3, %v2254_v47, 0.0 }
 0x3b2   : > { %v828_v51 = vsel %vm826_vm4, %v822_v48, 0  ;;  %v756_v52 = vsub.f32 %v718_v18, %v748_v49  ;;  %783 = vadd.xlane.f32.xlu1 %v782_v50 }
 0x3b3   : > { %1571 = vmatpush3.bf16.msra.mxu1 %v828_v51 }
 0x3b4   : > { %v771_v53 = vmul.f32 1.442695, %v756_v52  ;;  %1582 = vmatprep.subr.bf16.mxu1 %v1908_v0 }
 0x3b5   : > { %v871_v54 = vpop.permute.xlu1 %870  ;;  %v967_v3 = vpop.permute.xlu0 %966 }
 0x3b6   : > { %1723 = vpow2.f32 %v771_v53  ;;  %v876_v55 = vsel %vm826_vm4, %v871_v54, 0  ;;  %v972_v22 = vsel %vm826_vm4, %v967_v3, 0 }
 0x3b7   : > { %1577 = vmatpush3.bf16.msra.mxu0 %v876_v55  ;;  %1725 = vpow2.f32 %v765_v61 }
 0x3b8   : > { %v2261_v56 = vpop.eup %1721  ;;  %1588 = vmatprep.subr.bf16.mxu0 %v1908_v0  ;;  %1727 = vpow2.f32 %v769_v63 }
 0x3b9   : > { %v788_v57 = vsel %vm724_vm3, %v2261_v56, 0.0  ;;  %v919_v7 = vpop.permute.xlu1 %918 }
 0x3ba   : > { %789 = vadd.xlane.f32.xlu1 %v788_v57  ;;  %v924_v9 = vsel %vm826_vm4, %v919_v7, 0 }
 0x3bd   : > { %v1015_v10 = vpop.permute.xlu1 %1014 }
 0x3be   : > { %v1020_v30 = vsel %vm826_vm4, %v1015_v10, 0 }
 0x3c0   : > { %v2266_v58 = vpop.eup %1723 }
 0x3c1   : > { %v794_v59 = vsel %vm724_vm3, %v2266_v58, 0.0  ;;  %v2276_v2 = vpop.eup %1725 }
 0x3c2   : > { %795 = vadd.xlane.f32.xlu1 %v794_v59  ;;  %v785_v4 = vsel %vm724_vm3, %v2276_v2, 0.0  ;;  %v2280_v5 = vpop.eup %1727 }
 0x3c3   : > { %v791_v1 = vsel %vm724_vm3, %v2280_v5, 0.0 }
 0x3c4   : > { %1062 = vrot.lane.b32.xlu0 %v2160_v24, %s1918_s24 }
 0x3d3   : > { %1110 = vrot.lane.b32.xlu1 %v2164_v27, %s1918_s24 }
 0x3e3   : > { %786 = vadd.xlane.f32.xlu0 %v785_v4 }
 0x3e6   : > { %v775_v24 = vpop.xlane.xlu0 %774 }
 0x3e7   : > { %1729 = vrcp.f32 %v775_v24  ;;  %792 = vadd.xlane.f32.xlu0 %v791_v1 }
 0x3f1   : > { %v1730_v6 = vpop.eup %1729 }
 0x3f2   : > { %v805_v27 = vmul.f32 %v1730_v6, %v2242_v32 }
 0x3f4   : > { %v813_v8 = vpack.c.bf16 %v805_v27, %v805_v27 }
 0x3f6   : > { %1573 = vmatmul.mubr.msk.bf16.vlgmr.msra.gmra.mrb[16].mxu1 %vm724_vm3, %v813_v8 }
 0x3f7   : > { %1583 = vmatpush3.bf16.msra.mxu1 %v924_v9  ;;  %1584 = vmatprep.mubr.msk.bf16.mxu1 %vm1909_vm0, %v1908_v0 }
 0x3f8   : > { %1594 = vmatprep.subr.bf16.mxu1 %v1908_v0 }
 0x3fd   : > { %1158 = vrot.lane.b32.xlu0 %v2166_v28, %s1918_s24  ;;  %s2338_s24 = scalar_lea.hbm %s2387_s4, %s1466_s30 }
 0x437   : > { %v778_v11 = vpop.xlane.xlu1 %777 }
 0x438   : > { %1731 = vrcp.f32 %v778_v11 }
 0x43b   : > { %v781_v12 = vpop.xlane.xlu0 %780 }
 0x43c   : > { %1733 = vrcp.f32 %v781_v12  ;;  %v248_v12 = vld [vmem:[#allocation8] sm:$0xff] }
 0x43f   : > { %v784_v14 = vpop.xlane.xlu1 %783  ;;  %v1063_v32 = vpop.permute.xlu0 %1062 }
 0x440   : > { %1735 = vrcp.f32 %v784_v14  ;;  %v1068_v13 = vsel %vm826_vm4, %v1063_v32, 0  ;;  %v249_v14 = vld [vmem:[#allocation8 + $0x8] sm:$0xff] }
 0x442   : > { %v1732_v15 = vpop.eup %1731 }
 0x443   : > { %v806_v17 = vmul.f32 %v1732_v15, %v2246_v38 }
 0x445   : > { %v814_v18 = vpack.c.bf16 %v806_v17, %v806_v17  ;;  %v255_v17 = vpack.c.bf16 %v249_v14, %v248_v12 }
 0x446   : > { %v1734_v21 = vpop.eup %1733 }
 0x447   : > { %v807_v25 = vmul.f32 %v1734_v21, %v2250_v43  ;;  %1579 = vmatmul.mubr.msk.bf16.vlgmr.msra.gmra.mrb[20].mxu0 %vm724_vm3, %v814_v18  ;;  %v790_v26 = vpop.xlane.xlu1 %789  ;;  %v250_v18 = vld [vmem:[#allocation8 + $0x10] sm:$0xff]  ;;  %v251_v21 = vld [vmem:[#allocation8 + $0x18] sm:$0xff] }
 0x448   : > { %1589 = vmatpush3.bf16.msra.mxu0 %v972_v22  ;;  %1737 = vrcp.f32 %v790_v26  ;;  %1590 = vmatprep.mubr.msk.bf16.mxu0 %vm1909_vm0, %v1908_v0 }
 0x449   : > { %v815_v28 = vpack.c.bf16 %v807_v25, %v807_v25  ;;  %1600 = vmatprep.subr.bf16.mxu0 %v1908_v0 }
 0x44a   : > { %v1736_v29 = vpop.eup %1735 }
 0x44b   : > { %v808_v31 = vmul.f32 %v1736_v29, %v2254_v47  ;;  %1585 = vmatmul.mubr.msk.bf16.vlgmr.msra.gmra.mrb[20].mxu1 %vm724_vm3, %v815_v28  ;;  %v256_v29 = vpack.c.bf16 %v251_v21, %v250_v18 }
 0x44c   : > { %1595 = vmatpush3.bf16.msra.mxu1 %v1020_v30  ;;  %1596 = vmatprep.mubr.msk.bf16.mxu1 %vm1909_vm0, %v1908_v0 }
 0x44d   : > { %v816_v16 = vpack.c.bf16 %v808_v31, %v808_v31  ;;  %1606 = vmatprep.subr.bf16.mxu1 %v1908_v0 }
 0x44f   : > { %1591 = vmatmul.mubr.msk.bf16.vlgmr.msra.gmra.mrb[24].mxu0 %vm724_vm3, %v816_v16  ;;  %v796_v35 = vpop.xlane.xlu1 %795 }
 0x450   : > { %1601 = vmatpush3.bf16.msra.mxu0 %v1068_v13  ;;  %1602 = vmatprep.mubr.msk.bf16.mxu0 %vm1909_vm0, %v1908_v0  ;;  %1739 = vrcp.f32 %v796_v35 }
 0x451   : > { %1612 = vmatprep.subr.bf16.mxu0 %v1908_v0 }
 0x452   : > { %v1738_v33 = vpop.eup %1737 }
 0x453   : > { %v810_v34 = vmul.f32 %v1738_v33, %v2261_v56  ;;  %v1111_v43 = vpop.permute.xlu1 %1110 }
 0x454   : > { %v1116_v46 = vsel %vm826_vm4, %v1111_v43, 0 }
 0x455   : > { %v818_v20 = vpack.c.bf16 %v810_v34, %v810_v34 }
 0x457   : > { %1603 = vmatmul.mubr.msk.bf16.vlgmr.msra.gmra.mrb[28].mxu0 %vm724_vm3, %v818_v20 }
 0x458   : > { %1614 = vmatprep.mubr.msk.bf16.mxu0 %vm1909_vm0, %v1908_v0 }
 0x45a   : > { %v1740_v36 = vpop.eup %1739 }
 0x45b   : > { %v812_v37 = vmul.f32 %v1740_v36, %v2266_v58 }
 0x45d   : > { %v820_v41 = vpack.c.bf16 %v812_v37, %v812_v37 }
 0x470   : > { %v787_v19 = vpop.xlane.xlu0 %786 }
 0x471   : > { %1741 = vrcp.f32 %v787_v19 }
 0x474   : > { %v793_v23 = vpop.xlane.xlu0 %792 }
 0x475   : > { %1743 = vrcp.f32 %v793_v23 }
 0x478   : > { %v1159_v38 = vpop.permute.xlu0 %1158 }
 0x479   : > { %v1164_v39 = vsel %vm826_vm4, %v1159_v38, 0 }
 0x47a   : > { %1613 = vmatpush3.bf16.msra.mxu0 %v1164_v39  ;;  %v1463_v39 = vld [vmem:[%s2386_s3] ss:$0 sm:$0xff] }
 0x47b   : > { %v1742_v40 = vpop.eup %1741 }
 0x47c   : > { %v809_v42 = vmul.f32 %v1742_v40, %v2276_v2 }
 0x47d   : > { %1615 = vmatmul.mubr.msk.bf16.vlgmr.msra.gmra.mrb[32].mxu0 %vm724_vm3, %v820_v41 }
 0x47e   : > { %v817_v44 = vpack.c.bf16 %v809_v42, %v809_v42 }
 0x47f   : > { %v1744_v45 = vpop.eup %1743 }
 0x480   : > { %1597 = vmatmul.mubr.msk.bf16.vlgmr.msra.gmra.mrb[24].mxu1 %vm724_vm3, %v817_v44  ;;  %v811_v47 = vmul.f32 %v1744_v45, %v2280_v5 }
 0x481   : > { %1607 = vmatpush3.bf16.msra.mxu1 %v1116_v46  ;;  %1608 = vmatprep.mubr.msk.bf16.mxu1 %vm1909_vm0, %v1908_v0 }
 0x482   : > { %1618 = vmatprep.subr.bf16.mxu1 %v1908_v0  ;;  %v819_v48 = vpack.c.bf16 %v811_v47, %v811_v47 }
 0x488   : > { %1609 = vmatmul.mubr.msk.bf16.vlgmr.msra.gmra.mrb[28].mxu1 %vm724_vm3, %v819_v48 }
 0x489   : > { %1622 = vmatprep.mubr.msk.bf16.mxu1 %vm1909_vm0, %v1908_v0  ;;  %1619 = vmatpush3.bf16.msra.mxu1 %v255_v17 }
 0x48a   : > { %1620 = vmatprep.subr.bf16.mxu1 %v1908_v0 }
 0x48d   : > { %1621 = vmatpush3.bf16.msra.mxu1 %v256_v29 }
 0x4c9   : > { %v864_v49 = vpop.f32.mrb[16].mxu1 }
 0x4ca   : > { %v1206_v50 = vpack.c.bf16 %v864_v49, %v864_v49  ;;  %v1574_v51 = vpop.f32.mrb[17].mxu1 }
 0x4cb   : > { %v867_v52 = vpop.f32.mrb[18].mxu1 }
 0x4cc   : > { %1208 = vst.msk [vmem:[#allocation2] sm:$0xf] %vm1207_vm5, %v1206_v50  ;;  %v1575_v53 = vpop.f32.mrb[19].mxu1 }
 0x51a   : > { %v912_v54 = vpop.f32.mrb[20].mxu0 }
 0x51b   : > { %v1469_v55 = vpack.c.bf16 %v912_v54, %v912_v54  ;;  %v1580_v56 = vpop.f32.mrb[21].mxu0 }
 0x51c   : > { %v915_v57 = vpop.f32.mrb[22].mxu0 }
 0x51d   : > { %1213 = vrot.lane.b32.xlu1 %v1469_v55, %s1919_s20  ;;  %v1581_v58 = vpop.f32.mrb[23].mxu0  ;;  %s1926_s20 = smov [#allocation9]  }
 0x51e   : > { %v960_v59 = vpop.f32.mrb[20].mxu1 }
 0x51f   : > { %v1470_v60 = vpack.c.bf16 %v960_v59, %v960_v59  ;;  %v1586_v61 = vpop.f32.mrb[21].mxu1 }
 0x520   : > { %v963_v62 = vpop.f32.mrb[22].mxu1 }
 0x521   : > { %1222 = vrot.lane.b32.xlu0 %v1470_v60, %s1920_s28  ;;  %v1587_v63 = vpop.f32.mrb[23].mxu1  ;;  %s1835_s28 = sshll.u32 %s1926_s20, 4  ;;  %s1836_s28 = int_to_ptr.vmem [resolvable:$false] %s1835_s28 }
 0x522   : > { %v1008_v2 = vpop.f32.mrb[24].mxu0  ;;  %p1838_p7 = scmp.lt.s32.totalorder %s2340_s6, %s1836_s28 }
 0x523   : > { %v1471_v3 = vpack.c.bf16 %v1008_v2, %v1008_v2  ;;  %v1592_v4 = vpop.f32.mrb[25].mxu0 }
 0x524   : > { %v1011_v5 = vpop.f32.mrb[26].mxu0 }
 0x525   : > { %1231 = vrot.lane.b32.xlu1 %v1471_v3, %s1921_s11  ;;  %v1593_v24 = vpop.f32.mrb[27].mxu0  ;;  %s1837_s11 = scalar_lea.vmem %s1836_s28, 256 }
 0x526   : > { %p1839_p9 = scmp.lt.s32.totalorder %s1837_s11, %s1831_s25 }
 0x528   : > { %p1840_p12 = por %p1839_p9, %p1838_p7 }
 0x52a   : > { %v1104_v1 = vpop.f32.mrb[28].mxu0  ;;  %p1841_p2 = pnand %p1840_p12, %p1834_p3 }
 0x52b   : > { %v1473_v6 = vpack.c.bf16 %v1104_v1, %v1104_v1  ;;  %v1604_v27 = vpop.f32.mrb[29].mxu0 }
 0x52c   : > { %v1107_v7 = vpop.f32.mrb[30].mxu0 }
 0x52d   : > { %1249 = vrot.lane.b32.xlu1 %v1473_v6, %s1922_s12  ;;  %v1605_v8 = vpop.f32.mrb[31].mxu0 }
 0x550   : > { %v1200_v9 = vpop.f32.mrb[32].mxu0 }
 0x551   : > { %v1475_v10 = vpack.c.bf16 %v1200_v9, %v1200_v9  ;;  %v1616_v11 = vpop.f32.mrb[33].mxu0 }
 0x552   : > { %v1203_v15 = vpop.f32.mrb[34].mxu0 }
 0x553   : > { %v1056_v22 = vpop.f32.mrb[24].mxu1  ;;  %1267 = vrot.lane.b32.xlu1 %v1475_v10, %s1923_s7  ;;  %v1617_v25 = vpop.f32.mrb[35].mxu0 }
 0x554   : > { %v1472_v26 = vpack.c.bf16 %v1056_v22, %v1056_v22  ;;  %v1598_v28 = vpop.f32.mrb[25].mxu1 }
 0x555   : > { %v1059_v30 = vpop.f32.mrb[26].mxu1 }
 0x556   : > { %1240 = vrot.lane.b32.xlu0 %v1472_v26, %s1924_s8  ;;  %v1599_v31 = vpop.f32.mrb[27].mxu1 }
 0x55b   : > { %v1152_v32 = vpop.f32.mrb[28].mxu1 }
 0x55c   : > { %v1474_v16 = vpack.c.bf16 %v1152_v32, %v1152_v32  ;;  %v1610_v13 = vpop.f32.mrb[29].mxu1 }
 0x55d   : > { %v1155_v33 = vpop.f32.mrb[30].mxu1 }
 0x55e   : > { %1258 = vrot.lane.b32.xlu0 %v1474_v16, %s1925_s21  ;;  %v1611_v34 = vpop.f32.mrb[31].mxu1 }
 0x58f   : > { %v1214_v20 = vpop.permute.xlu1 %1213 }
 0x590   : > { %1217 = vst.msk [vmem:[#allocation2] sm:$0xf] %vm1216_vm6, %v1214_v20 }
 0x593   : > { %v1223_v35 = vpop.permute.xlu0 %1222 }
 0x594   : > { %1226 = vst.msk [vmem:[#allocation2] sm:$0xf] %vm1225_vm7, %v1223_v35 }
 0x597   : > { %v1232_v19 = vpop.permute.xlu1 %1231 }
 0x598   : > { %1235 = vst.msk [vmem:[#allocation2] sm:$0xf] %vm1234_vm8, %v1232_v19 }
 0x59f   : > { %v1250_v36 = vpop.permute.xlu1 %1249 }
 0x5c5   : > { %v1268_v37 = vpop.permute.xlu1 %1267 }
 0x5c8   : > { %v1241_v0 = vpop.permute.xlu0 %1240 }
 0x5c9   : > { %1244 = vst.msk [vmem:[#allocation2] sm:$0xf] %vm1243_vm9, %v1241_v0 }
 0x5ca   : > { %1253 = vst.msk [vmem:[#allocation2] sm:$0xf] %vm1252_vm10, %v1250_v36 }
 0x5d0   : > { %v1259_v23 = vpop.permute.xlu0 %1258 }
 0x5d1   : > { %1262 = vst.msk [vmem:[#allocation2] sm:$0xf] %vm1261_vm11, %v1259_v23 }
 0x5d2   : > { %1271 = vst.msk [vmem:[#allocation2] sm:$0xf] %vm1270_vm12, %v1268_v37 }
 0x5d9   : > { %v1272_v38 = vld [vmem:[#allocation2] sm:$0xf] }
 0x5da   : > { %1623 = vmatmul.mubr.msk.bf16.vlgmr.msra.gmra.mrb[32].mxu1 %vm257_vm1, %v1272_v38 }
 0x6ad   : > { %v1317_v40 = vpop.f32.mrb[32].mxu1 }
 0x6ae   : > { %v1318_v41 = vadd.f32 %v1463_v39, %v1317_v40  ;;  %v1624_v42 = vpop.f32.mrb[33].mxu1 }
 0x6af   : > { %v1320_v43 = vpop.f32.mrb[34].mxu1 }
 0x6b0   : > { %v1625_v44 = vpop.f32.mrb[35].mxu1  ;;  %1323 = vst.msk [vmem:[%s241_s5] sm:$0xff] %vm257_vm1, %v1318_v41 }
 0x6b1   : > { %1844 = shalt.err (!%p1841_p2)
}
 0x6b2   : > { %s1845_s29 = scalar_lea.hbm %s2338_s24, 128  ;;  %s1849_s8 = scalar_lea.hbm %s2387_s4, 256 }
 0x6b3   : > { %p1846_p13 = scmp.ne.s32.totalorder %s2338_s24, %s1845_s29  ;;  %p1850_p4 = scmp.lt.u32.totalorder %s2338_s24, %s2387_s4 }
 0x6b4   : > { %p1851_p5 = scmp.lt.u32.totalorder %s1849_s8, %s1845_s29  ;;  %p1853_p11 = scmp.lt.u32.totalorder %s1845_s29, %s2338_s24 }
 0x6b5   : > { %p1847_p6 = pnand %p1846_p13, %p2401_p0 }
 0x6b6   : > { %p1852_p8 = por %p1851_p5, %p1850_p4 }
 0x6b7   : > { %p1848_p10 = pneg %p1847_p6 }
 0x6b8   : > { %p1854_p1 = por %p1853_p11, %p1852_p8 }
 0x6ba   : > { %p1855_p3 = pnand %p1854_p1, %p1848_p10 }
 0x6bc   : > { %1858 = shalt.err (!%p1855_p3)
}
 0x6bd   : > { %1636 = dma.vmem_to_hbm [thread:$0]  (%p2401_p0), %s2340_s6, 128, %s2338_s24, %s1325_s19  }
 0x6be PF: > { %s1350_s27 = sand.u32 1, %s1889_s15   ;;  %p2402_p7 = scmp.ne.s32.totalorder %s2392_s22, 0 }
 0x6bf   : > { %p2403_p9 = scmp.ge.s32.totalorder %s1901_s18, 2  ;;  %s1351_s30 = scalar_lea.sflag [#allocation5], %s1350_s27 }
 0x6c1   : > { %p1650_p12 = pnand %p2403_p9, %p2402_p7 }
 0x6c3   : > { %1884 = dma.done.wait (!%p1650_p12), %s1351_s30, 128  }
 0x6c4   : > { %1886 = vsyncadd (!%p1650_p12), %s1351_s30, 4294967168  ;;  %p18_p2 = scmp.ge.s32.totalorder %s2062_s9, 4   ;;  %s2404_s15 = smov %s1893_s16 }
 0x6c5   : > { %s2405_s16 = smov %s1897_s17  ;;  %s2406_s17 = smov %s2078_s14 }
 0x6c6   : > { %s2407_s18 = smov %s2062_s9  ;;  %20 = sbr.rel (!%p18_p2) target bundleno = 6 (0x6), region = 89 }
 0x6cd   :  { %1356 = vsyncpa [#allocation4], 1 }
 0x6ce   :  { %1358 = vsyncpa [#allocation4 + $0x1], 1 }
 0x6cf   :  { %1359 = vsyncpa [#allocation7], 1 }
 0x6d0   :  { %1360 = vsyncpa [#allocation5], 1 }
 0x6d1   :  { %1362 = vsyncpa [#allocation5 + $0x1], 1 }

// kernel: tpu_custom_call.1
= control target key start
LH: loop header
LB: loop body
LE: loop exit
PB: predicated region body
PF: predicated region fallthrough
CT: control target
= control target key end

     0   :  { %9 = vsyncpa [#allocation4], 0  ;;  %s2383_s0 = inlined_call_operand.hbm [shape: f32[16,32], index: 0, kind: input, shape index: {}]   ;;  %s2384_s1 = inlined_call_operand.hbm [shape: f32[32,96], index: 1, kind: input, shape index: {}]   ;;  %s2385_s2 = inlined_call_operand.hbm [shape: f32[32,32], index: 2, kind: input, shape index: {}]   ;;  %s2386_s3 = inlined_call_operand.vmem [shape: f32[1,32], index: 3, kind: input, shape index: {}]   ;;  %s2387_s4 = inlined_call_operand.hbm [shape: f32[16,32], index: 4, kind: output, shape index: {}]  }
   0x1   :  { %11 = vsyncpa [#allocation4 + $0x1], 0 }
   0x2   :  { %12 = vsyncpa [#allocation7], 0 }
   0x3   :  { %13 = vsyncpa [#allocation5], 0 }
   0x4   :  { %15 = vsyncpa [#allocation5 + $0x1], 0  ;;  %s1952_s15 = smov 0   ;;  %s1954_s16 = smov 0  }
   0x5   :  { %s1956_s17 = smov 0   ;;  %s1958_s18 = smov 0  }
   0x6 LB: > { %s1973_s19 = sadd.s32 4294967295, %s1901_s18   ;;  %s1427_s20 = sadd.s32 4294967294, %s1901_s18   ;;  %s1901_s18 = sphi %s1958_s18, %s2407_s18   ;;  %s1897_s17 = sphi %s1956_s17, %s2406_s17   ;;  %s1893_s16 = sphi %s1954_s16, %s2405_s16   ;;  %s1889_s15 = sphi %s1952_s15, %s2404_s15  }
   0x7   : > { %p41_p0 = scmp.ne.s32.totalorder %s1893_s16, %s1889_s15  ;;  %p2388_p1 = scmp.eq.s32.totalorder %s1973_s19, 0 }
   0x8   : > { %p134_p3 = scmp.eq.s32.totalorder %s1427_s20, 1  ;;  %p1428_p5 = scmp.ge.s32.totalorder %s1901_s18, 1 }
   0x9   : > { %p1982_p4 = por %p2388_p1, %p41_p0  ;;  %p141_p7 = scmp.lt.s32.totalorder %s1901_s18, 3 }
   0xa   : > { %p1987_p6 = por %p134_p3, %p41_p0  ;;  %s1903_s24 = smov [#allocation6]  }
   0xb   : > { %s2391_s21 = scalar_select %p1982_p4, 1, 0 }
   0xc   : > { %s2392_s22 = scalar_select %p1987_p6, 1, 0 }
   0xd   : > { %p1992_p8 = pnand %p1428_p5, %p141_p7  ;;  %s153_s25 = sshll.u32 %s1903_s24, 4  ;;  %s1996_s25 = int_to_ptr.vmem [resolvable:$true] %s153_s25 }
   0xe   : > { %s1904_s27 = smov [#allocation8]   ;;  %s1745_s5 = scalar_lea.hbm %s2384_s1, 512 }
   0xf   : > { %p1638_p9 = pneg %p1992_p8  ;;  %s166_s28 = sshll.u32 %s1904_s27, 4  ;;  %s2007_s28 = int_to_ptr.vmem [resolvable:$true] %s166_s28 }
  0x10   : > { %p1746_p12 = scmp.ne.s32.totalorder %s2384_s1, %s1745_s5  ;;  %p1752_p5 = scmp.lt.u32.totalorder %s1745_s5, %s2384_s1 }
  0x11   : > { %p2003_p11 = pnand %p1638_p9, %p2388_p1 }
  0x13   : > { %p1747_p13 = pneg %p2003_p11 }
  0x15   : > { %p1748_p0 = pnand %p1747_p13, %p1746_p12 }
  0x17   : > { %p1749_p3 = pneg %p1748_p0 }
  0x19   : > { %p1754_p7 = pnand %p1752_p5, %p1749_p3 }
  0x1b   : > { %1757 = shalt.err (!%p1754_p7)
}
  0x1c   : > { %s1758_s10 = scalar_lea.vmem %s1996_s25, 512  ;;  %p1766_p2 = scmp.lt.s32.totalorder %s1996_s25, %s1996_s25 }
  0x1d   : > { %p1759_p9 = scmp.ne.s32.totalorder %s1996_s25, %s1758_s10  ;;  %p1767_p12 = scmp.lt.s32.totalorder %s1758_s10, %s1758_s10 }
  0x1f   : > { %p1761_p10 = pnand %p1759_p9, %p1747_p13  ;;  %p1768_p0 = por %p1767_p12, %p1766_p2 }
  0x21   : > { %p1762_p1 = pneg %p1761_p10 }
  0x23   : > { %p1769_p6 = pnand %p1768_p0, %p1762_p1 }
  0x25   : > { %1772 = shalt.err (!%p1769_p6)
}
  0x26   : > { %s1905_s11 = smov 128   ;;  %s1906_s12 = smov 8  }
  0x27   : > { %1641 = dma.hbm_to_vmem [thread:$0]  (!%p2003_p11), %s2384_s1, 512, %s1996_s25, [#allocation7], %s1905_s11, %s1905_s11, %s1906_s12  }
  0x28   : > { %s1773_s27 = scalar_lea.hbm %s2385_s2, 512 }
  0x29   : > { %p1774_p2 = scmp.ne.s32.totalorder %s2385_s2, %s1773_s27  ;;  %p1780_p10 = scmp.lt.u32.totalorder %s1773_s27, %s2385_s2 }
  0x2b   : > { %p1776_p1 = pnand %p1774_p2, %p1747_p13 }
  0x2d   : > { %p1777_p6 = pneg %p1776_p1 }
  0x2f   : > { %p1782_p3 = pnand %p1780_p10, %p1777_p6 }
  0x31   : > { %1785 = shalt.err (!%p1782_p3)
}
  0x32   : > { %s1786_s25 = scalar_lea.vmem %s2007_s28, 512  ;;  %p1794_p12 = scmp.lt.s32.totalorder %s2007_s28, %s2007_s28 }
  0x33   : > { %p1787_p5 = scmp.ne.s32.totalorder %s2007_s28, %s1786_s25  ;;  %p1795_p0 = scmp.lt.s32.totalorder %s1786_s25, %s1786_s25 }
  0x35   : > { %p1789_p7 = pnand %p1787_p5, %p1747_p13  ;;  %p1796_p2 = por %p1795_p0, %p1794_p12 }
  0x37   : > { %p1790_p9 = pneg %p1789_p7 }
  0x39   : > { %p1797_p1 = pnand %p1796_p2, %p1790_p9 }
  0x3b   : > { %1800 = shalt.err (!%p1797_p1)
}
  0x3c   : > { %1644 = dma.hbm_to_vmem [thread:$0]  (!%p2003_p11), %s2385_s2, 512, %s2007_s28, [#allocation7], %s1905_s11, %s1905_s11, %s1906_s12  }
  0x3d   : > { %s2062_s9 = sadd.s32 1, %s1901_s18   ;;  %s28_s26 = sadd.s32 1, %s1897_s17 }
  0x3e   : > { %s25_s10 = ssub.s32 %s1901_s18, %s2062_s9  ;;  %p35_p13 = scmp.ne.s32.totalorder %s1897_s17, %s1893_s16 }
  0x3f   : > { %p26_p6 = scmp.eq.s32.totalorder %s25_s10, 0  ;;  %p36_p10 = scmp.eq.s32.totalorder %s1901_s18, 0 }
  0x40   : > { %p2395_p3 = scmp.eq.s32.totalorder %s1973_s19, 1  ;;  %p1655_p7 = scmp.lt.s32.totalorder %s1901_s18, 2 }
  0x41   : > { %s2078_s14 = scalar_select %p26_p6, %s1897_s17, %s28_s26  }
  0x42   : > { %p2072_p5 = por %p2395_p3, %p35_p13  ;;  %p37_p9 = por %p36_p10, %p35_p13 }
  0x43   : > { %s183_s20 = sand.u32 1, %s1897_s17   ;;  %s1433_s28 = sshll.u32 %s1901_s18, 7 }
  0x44   : > { %s2396_s13 = scalar_select %p2072_p5, 1, 0 }
  0x45   : > { %s1432_s24 = sshll.u32 %s183_s20, 3  ;;  %s2085_s27 = scalar_lea.hbm %s2383_s0, %s1433_s28 }
  0x46   : > { %s187_s29 = scalar_lea.vmem [#allocation3], %s1432_s24  ;;  %p2089_p11 = pnand %p1655_p7, %p37_p9 }
  0x47   : > { %s194_s30 = sshll.u32 %s187_s29, 4  ;;  %s184_s6 = scalar_lea.sflag [#allocation4], %s183_s20  ;;  %s2087_s30 = int_to_ptr.vmem [resolvable:$true] %s194_s30 }
  0x48   : > { %s1801_s25 = scalar_lea.hbm %s2085_s27, 128  ;;  %p1803_p0 = pneg %p2089_p11 }
  0x49   : > { %p1802_p12 = scmp.ne.s32.totalorder %s2085_s27, %s1801_s25  ;;  %s1806_s26 = scalar_lea.hbm %s2383_s0, 256 }
  0x4a   : > { %p1807_p13 = scmp.lt.u32.totalorder %s2085_s27, %s2383_s0  ;;  %p1808_p6 = scmp.lt.u32.totalorder %s1806_s26, %s1801_s25 }
  0x4b   : > { %p1804_p2 = pnand %p1803_p0, %p1802_p12  ;;  %p1810_p3 = scmp.lt.u32.totalorder %s1801_s25, %s2085_s27 }
  0x4c   : > { %p1809_p10 = por %p1808_p6, %p1807_p13 }
  0x4d   : > { %p1805_p1 = pneg %p1804_p2 }
  0x4e   : > { %p1811_p7 = por %p1810_p3, %p1809_p10 }
  0x50   : > { %p1812_p9 = pnand %p1811_p7, %p1805_p1 }
  0x52   : > { %1815 = shalt.err (!%p1812_p9)
}
  0x53   : > { %s1816_s20 = scalar_lea.vmem %s2087_s30, 128  ;;  %s1907_s28 = smov [#allocation3]  }
  0x54   : > { %p1817_p12 = scmp.ne.s32.totalorder %s2087_s30, %s1816_s20  ;;  %s1821_s11 = sshll.u32 %s1907_s28, 4  ;;  %s1822_s11 = int_to_ptr.vmem [resolvable:$false] %s1821_s11 }
  0x55   : > { %s1823_s12 = scalar_lea.vmem %s1822_s11, 256  ;;  %p1824_p4 = scmp.lt.s32.totalorder %s2087_s30, %s1822_s11 }
  0x56   : > { %p1819_p2 = pnand %p1817_p12, %p1803_p0  ;;  %p1825_p13 = scmp.lt.s32.totalorder %s1823_s12, %s1816_s20 }
  0x58   : > { %p1820_p5 = pneg %p1819_p2  ;;  %p1826_p6 = por %p1825_p13, %p1824_p4 }
  0x5a   : > { %p1827_p10 = pnand %p1826_p6, %p1820_p5 }
  0x5c   : > { %1830 = shalt.err (!%p1827_p10)
}
  0x5d   : > { %1648 = dma.hbm_to_vmem [thread:$0]  (!%p2089_p11), %s2085_s27, 128, %s2087_s30, %s184_s6  }
  0x5e   : > { %203 = sbr.rel (%p1992_p8) target bundleno = 1726 (0x6be), region = 36  ;;  %s2121_s29 = sand.u32 (!%p1992_p8), 1, %s1893_s16  }
  0x5f   : > { %s1435_s25 = sshll.u32 (!%p1992_p8), %s2121_s29, 3  ;;  %s206_s7 = scalar_lea.sflag (!%p1992_p8), [#allocation4], %s2121_s29 }
  0x60   : > { %s209_s8 = scalar_lea.vmem (!%p1992_p8), [#allocation3], %s1435_s25  ;;  %p2398_p4 = scmp.ne.s32.totalorder (!%p1992_p8), %s2391_s21, 0 }
  0x65   : > { %1876 = dma.done.wait (%p2398_p4), %s206_s7, 128  }
  0x66   : > { %1878 = vsyncadd (%p2398_p4), %s206_s7, 4294967168  ;;  %p2399_p5 = scmp.eq.s32.totalorder %s1973_s19, 0 }
  0x68   : > { %1880 = dma.done.wait (%p2399_p5), [#allocation7], 1024   ;;  %p2400_p8 = pmov %p2399_p5 }
  0x69   : > { %v1908_v0 = vmov 0.0   ;;  %vm1909_vm0 = vmmov 0   ;;  %v244_v1 = vld [vmem:[#allocation6] sm:$0xff]  ;;  %v245_v2 = vld [vmem:[#allocation6 + $0x8] sm:$0xff]  ;;  %v246_v3 = vld [vmem:[#allocation6 + $0x10] sm:$0xff]  ;;  %vm257_vm1 = vcmask 261120  }
  0x6a   : > { %1882 = vsyncadd (%p2400_p8), [#allocation7], 4294966272  ;;  %1514 = vmatprep.subr.bf16.mxu0 %v1908_v0  ;;  %1518 = vmatprep.mubr.msk.bf16.mxu0 %vm1909_vm0, %v1908_v0  ;;  %v253_v4 = vpack.c.bf16 %v245_v2, %v244_v1  ;;  %v247_v5 = vld [vmem:[#allocation6 + $0x18] sm:$0xff]  ;;  %s1910_s21 = smov 116   ;;  %s1911_s23 = smov 124   ;;  %vm334_vm2 = vcmask 31744  }
  0x6b   : > { %1522 = vmatprep.subr.bf16.mxu1 %v1908_v0  ;;  %1524 = vmatprep.mubr.msk.bf16.mxu1 %vm1909_vm0, %v1908_v0  ;;  %v254_v6 = vpack.c.bf16 %v247_v5, %v246_v3  ;;  %v243_v7 = vld [vmem:[%s209_s8] sm:$0xff]  ;;  %s1912_s27 = smov 112   ;;  %s1913_s30 = smov 120   ;;  %vm724_vm3 = vcmask 64512   ;;  %vm826_vm4 = vcmask 1043456   ;;  %vm1207_vm5 = vcmask 27648  }
  0x6c   : > { %1515 = vmatpush3.bf16.msra.mxu0 %v253_v4  ;;  %v252_v8 = vpack.c.bf16 %v243_v7, %v243_v7  ;;  %s1914_s5 = smov 104   ;;  %s1915_s6 = smov 108   ;;  %vm1216_vm6 = vcmask 60448   ;;  %vm1225_vm7 = vcmask 93248   ;;  %vm1234_vm8 = vcmask 126048  }
  0x6d   : > { %1516 = vmatprep.subr.bf16.mxu0 %v1908_v0  ;;  %s1916_s26 = smov 100   ;;  %s1917_s10 = smov 96   ;;  %vm1243_vm9 = vcmask 158848   ;;  %vm1252_vm10 = vcmask 191648   ;;  %vm1261_vm11 = vcmask 224448   ;;  %vm1270_vm12 = vcmask 257248  }
  0x6e   : > { %s1918_s24 = smov 64   ;;  %s1919_s20 = smov 4  }
  0x6f   : > { %s1920_s28 = smov 8   ;;  %s1921_s11 = smov 12  }
  0x70   : > { %1517 = vmatpush3.bf16.msra.mxu0 %v254_v6  ;;  %s1922_s12 = smov 20   ;;  %s1923_s7 = smov 28  }
  0x71   : > { %1528 = vmatprep.subr.bf16.mxu0 %v1908_v0  ;;  %s1924_s8 = smov 16   ;;  %p2401_p0 = scmp.ne.s32.totalorder %s2396_s13, 0 }
  0x73   : > { %1519 = vmatmul.mubr.msk.bf16.vlgmr.msra.gmra.mrb[0].mxu0 %vm257_vm1, %v252_v8 }
  0x74   : > { %1530 = vmatprep.mubr.msk.bf16.mxu0 %vm1909_vm0, %v1908_v0 }
 0x146   : > { %v295_v9 = vpop.f32.mrb[0].mxu0 }
 0x147   : > { %308 = vrot.lane.b32.xlu1 %v295_v9, %s1910_s21  ;;  %302 = vrot.lane.b32.xlu0 %v295_v9, %s1911_s23  ;;  %v1520_v10 = vpop.f32.mrb[1].mxu0  ;;  %v2146_v13 = vpack.c.bf16 %v295_v9, %v295_v9  ;;  %s1925_s21 = smov 24  }
 0x148   : > { %v298_v11 = vpop.f32.mrb[2].mxu0 }
 0x149   : > { %v1521_v12 = vpop.f32.mrb[3].mxu0 }
 0x14b   : > { %311 = vrot.lane.b32.xlu1 %v295_v9, %s1912_s27  ;;  %305 = vrot.lane.b32.xlu0 %v295_v9, %s1913_s30  ;;  %s1466_s30 = sshll.u32 %s1973_s19, 7  ;;  %s1325_s19 = scalar_lea.sflag [#allocation5], %s2121_s29 }
 0x14f   : > { %317 = vrot.lane.b32.xlu1 %v295_v9, %s1914_s5  ;;  %314 = vrot.lane.b32.xlu0 %v295_v9, %s1915_s6  ;;  %s241_s5 = scalar_lea.vmem [#allocation9], %s1435_s25 }
 0x150   : > { %s1338_s6 = sshll.u32 %s241_s5, 4  ;;  %s2340_s6 = int_to_ptr.vmem [resolvable:$true] %s1338_s6 }
 0x151   : > { %s1831_s25 = scalar_lea.vmem %s2340_s6, 128 }
 0x152   : > { %p1832_p11 = scmp.ne.s32.totalorder %s2340_s6, %s1831_s25 }
 0x153   : > { %320 = vrot.lane.b32.xlu0 %v295_v9, %s1916_s26  ;;  %332 = vrot.lane.b32.xlu1 %v2146_v13, %s1917_s10 }
 0x154   : > { %p1833_p1 = pnand %p1832_p11, %p2401_p0 }
 0x156   : > { %p1834_p3 = pneg %p1833_p1 }
 0x1b9   : > { %v309_v14 = vpop.permute.xlu1 %308  ;;  %v303_v15 = vpop.permute.xlu0 %302 }
 0x1ba   : > { %v2149_v16 = vpack.c.bf16 %v303_v15, %v303_v15  ;;  %v2152_v19 = vpack.c.bf16 %v309_v14, %v309_v14 }
 0x1bc   : > { %382 = vrot.lane.b32.xlu0 %v2149_v16, %s1917_s10 }
 0x1bd   : > { %v312_v17 = vpop.permute.xlu1 %311  ;;  %v306_v18 = vpop.permute.xlu0 %305 }
 0x1be   : > { %v2154_v20 = vpack.c.bf16 %v306_v18, %v306_v18  ;;  %v2158_v23 = vpack.c.bf16 %v312_v17, %v312_v17 }
 0x1c0   : > { %480 = vrot.lane.b32.xlu0 %v2152_v19, %s1917_s10  ;;  %431 = vrot.lane.b32.xlu1 %v2154_v20, %s1917_s10 }
 0x1c1   : > { %v318_v21 = vpop.permute.xlu1 %317  ;;  %v315_v22 = vpop.permute.xlu0 %314 }
 0x1c2   : > { %v2160_v24 = vpack.c.bf16 %v315_v22, %v315_v22  ;;  %v2164_v27 = vpack.c.bf16 %v318_v21, %v318_v21 }
 0x1c4   : > { %578 = vrot.lane.b32.xlu0 %v2160_v24, %s1917_s10  ;;  %529 = vrot.lane.b32.xlu1 %v2158_v23, %s1917_s10 }
 0x1c5   : > { %v321_v25 = vpop.permute.xlu0 %320  ;;  %v333_v26 = vpop.permute.xlu1 %332 }
 0x1c6   : > { %v2166_v28 = vpack.c.bf16 %v321_v25, %v321_v25  ;;  %v339_v29 = vsel %vm334_vm2, %v333_v26, 0 }
 0x1c7   : > { %1523 = vmatpush3.bf16.xpose.msra.mxu1 %v339_v29 }
 0x1c8   : > { %676 = vrot.lane.b32.xlu0 %v2166_v28, %s1917_s10  ;;  %627 = vrot.lane.b32.xlu1 %v2164_v27, %s1917_s10 }
 0x1c9   : > { %1534 = vmatprep.subr.bf16.mxu1 %v1908_v0 }
 0x1ce   : > { %1525 = vmatmul.mubr.msk.bf16.vlgmr.msra.gmra.mrb[0].mxu1 %vm334_vm2, %v2146_v13 }
 0x1cf   : > { %1536 = vmatprep.mubr.msk.bf16.mxu1 %vm1909_vm0, %v1908_v0 }
 0x22e   : > { %v383_v30 = vpop.permute.xlu0 %382 }
 0x22f   : > { %v388_v31 = vsel %vm334_vm2, %v383_v30, 0 }
 0x230   : > { %1529 = vmatpush3.bf16.xpose.msra.mxu0 %v388_v31 }
 0x231   : > { %1540 = vmatprep.subr.bf16.mxu0 %v1908_v0 }
 0x232   : > { %v432_v32 = vpop.permute.xlu1 %431  ;;  %v481_v34 = vpop.permute.xlu0 %480 }
 0x233   : > { %v437_v33 = vsel %vm334_vm2, %v432_v32, 0  ;;  %v486_v35 = vsel %vm334_vm2, %v481_v34, 0 }
 0x234   : > { %1535 = vmatpush3.bf16.xpose.msra.mxu1 %v437_v33 }
 0x235   : > { %1546 = vmatprep.subr.bf16.mxu1 %v1908_v0 }
 0x236   : > { %v530_v36 = vpop.permute.xlu1 %529  ;;  %v579_v38 = vpop.permute.xlu0 %578 }
 0x237   : > { %1531 = vmatmul.mubr.msk.bf16.vlgmr.msra.gmra.mrb[4].mxu0 %vm334_vm2, %v2149_v16  ;;  %v535_v37 = vsel %vm334_vm2, %v530_v36, 0  ;;  %v584_v39 = vsel %vm334_vm2, %v579_v38, 0 }
 0x238   : > { %1541 = vmatpush3.bf16.xpose.msra.mxu0 %v486_v35  ;;  %1542 = vmatprep.mubr.msk.bf16.mxu0 %vm1909_vm0, %v1908_v0 }
 0x239   : > { %1552 = vmatprep.subr.bf16.mxu0 %v1908_v0 }
 0x23a   : > { %v628_v40 = vpop.permute.xlu1 %627  ;;  %v677_v42 = vpop.permute.xlu0 %676 }
 0x23b   : > { %1537 = vmatmul.mubr.msk.bf16.vlgmr.msra.gmra.mrb[4].mxu1 %vm334_vm2, %v2154_v20  ;;  %v633_v41 = vsel %vm334_vm2, %v628_v40, 0  ;;  %v682_v43 = vsel %vm334_vm2, %v677_v42, 0 }
 0x23c   : > { %1547 = vmatpush3.bf16.xpose.msra.mxu1 %v535_v37  ;;  %1548 = vmatprep.mubr.msk.bf16.mxu1 %vm1909_vm0, %v1908_v0 }
 0x23d   : > { %1558 = vmatprep.subr.bf16.mxu1 %v1908_v0 }
 0x23f   : > { %1543 = vmatmul.mubr.msk.bf16.vlgmr.msra.gmra.mrb[8].mxu0 %vm334_vm2, %v2152_v19 }
 0x240   : > { %1553 = vmatpush3.bf16.xpose.msra.mxu0 %v584_v39  ;;  %1554 = vmatprep.mubr.msk.bf16.mxu0 %vm1909_vm0, %v1908_v0 }
 0x241   : > { %1564 = vmatprep.subr.bf16.mxu0 %v1908_v0 }
 0x243   : > { %1549 = vmatmul.mubr.msk.bf16.vlgmr.msra.gmra.mrb[8].mxu1 %vm334_vm2, %v2158_v23 }
 0x244   : > { %1559 = vmatpush3.bf16.xpose.msra.mxu1 %v633_v41  ;;  %1560 = vmatprep.mubr.msk.bf16.mxu1 %vm1909_vm0, %v1908_v0 }
 0x245   : > { %1570 = vmatprep.subr.bf16.mxu1 %v1908_v0 }
 0x247   : > { %1555 = vmatmul.mubr.msk.bf16.vlgmr.msra.gmra.mrb[12].mxu0 %vm334_vm2, %v2160_v24 }
 0x248   : > { %1565 = vmatpush3.bf16.xpose.msra.mxu0 %v682_v43  ;;  %1566 = vmatprep.mubr.msk.bf16.mxu0 %vm1909_vm0, %v1908_v0 }
 0x249   : > { %1576 = vmatprep.subr.bf16.mxu0 %v1908_v0 }
 0x24b   : > { %1561 = vmatmul.mubr.msk.bf16.vlgmr.msra.gmra.mrb[12].mxu1 %vm334_vm2, %v2164_v27 }
 0x24c   : > { %1572 = vmatprep.mubr.msk.bf16.mxu1 %vm1909_vm0, %v1908_v0 }
 0x24f   : > { %1567 = vmatmul.mubr.msk.bf16.vlgmr.msra.gmra.mrb[16].mxu0 %vm334_vm2, %v2166_v28 }
 0x250   : > { %1578 = vmatprep.mubr.msk.bf16.mxu0 %vm1909_vm0, %v1908_v0 }
 0x2a1   : > { %v375_v44 = vpop.f32.mrb[0].mxu1 }
 0x2a2   : > { %v1526_v45 = vpop.f32.mrb[1].mxu1  ;;  %v725_v46 = vsel %vm724_vm3, %v375_v44, -inf }
 0x2a3   : > { %726 = vmax.xlane.f32.xlu1 %v725_v46  ;;  %v378_v47 = vpop.f32.mrb[2].mxu1 }
 0x2a4   : > { %v1527_v48 = vpop.f32.mrb[3].mxu1 }
 0x30a   : > { %v424_v49 = vpop.f32.mrb[4].mxu0 }
 0x30b   : > { %v1532_v50 = vpop.f32.mrb[5].mxu0  ;;  %v728_v51 = vsel %vm724_vm3, %v424_v49, -inf }
 0x30c   : > { %729 = vmax.xlane.f32.xlu0 %v728_v51  ;;  %v427_v52 = vpop.f32.mrb[6].mxu0 }
 0x30d   : > { %v1533_v53 = vpop.f32.mrb[7].mxu0 }
 0x30e   : > { %v473_v54 = vpop.f32.mrb[4].mxu1 }
 0x30f   : > { %v1538_v55 = vpop.f32.mrb[5].mxu1  ;;  %v731_v56 = vsel %vm724_vm3, %v473_v54, -inf }
 0x310   : > { %v476_v57 = vpop.f32.mrb[6].mxu1  ;;  %732 = vmax.xlane.f32.xlu0 %v731_v56 }
 0x311   : > { %v1539_v58 = vpop.f32.mrb[7].mxu1 }
 0x312   : > { %v522_v59 = vpop.f32.mrb[8].mxu0 }
 0x313   : > { %v1544_v60 = vpop.f32.mrb[9].mxu0  ;;  %v734_v61 = vsel %vm724_vm3, %v522_v59, -inf }
 0x314   : > { %735 = vmax.xlane.f32.xlu1 %v734_v61  ;;  %v525_v62 = vpop.f32.mrb[10].mxu0 }
 0x315   : > { %v1545_v63 = vpop.f32.mrb[11].mxu0 }
 0x316   : > { %v2222_v1 = vpop.f32.mrb[8].mxu1 }
 0x317   : > { %v1550_v2 = vpop.f32.mrb[9].mxu1  ;;  %v737_v3 = vsel %vm724_vm3, %v2222_v1, -inf }
 0x318   : > { %v574_v4 = vpop.f32.mrb[10].mxu1  ;;  %738 = vmax.xlane.f32.xlu0 %v737_v3 }
 0x319   : > { %v1551_v5 = vpop.f32.mrb[11].mxu1 }
 0x31a   : > { %v620_v6 = vpop.f32.mrb[12].mxu0 }
 0x31b   : > { %v1556_v7 = vpop.f32.mrb[13].mxu0  ;;  %v740_v8 = vsel %vm724_vm3, %v620_v6, -inf }
 0x31c   : > { %741 = vmax.xlane.f32.xlu1 %v740_v8  ;;  %v623_v9 = vpop.f32.mrb[14].mxu0 }
 0x31d   : > { %v1557_v10 = vpop.f32.mrb[15].mxu0 }
 0x31e   : > { %v2227_v11 = vpop.f32.mrb[12].mxu1 }
 0x31f   : > { %v1562_v12 = vpop.f32.mrb[13].mxu1  ;;  %v743_v14 = vsel %vm724_vm3, %v2227_v11, -inf }
 0x320   : > { %v672_v15 = vpop.f32.mrb[14].mxu1  ;;  %744 = vmax.xlane.f32.xlu0 %v743_v14 }
 0x321   : > { %v1563_v17 = vpop.f32.mrb[15].mxu1 }
 0x322   : > { %v718_v18 = vpop.f32.mrb[16].mxu0 }
 0x323   : > { %v1568_v21 = vpop.f32.mrb[17].mxu0  ;;  %v746_v22 = vsel %vm724_vm3, %v718_v18, -inf }
 0x324   : > { %747 = vmax.xlane.f32.xlu1 %v746_v22  ;;  %v721_v25 = vpop.f32.mrb[18].mxu0 }
 0x325   : > { %v1569_v26 = vpop.f32.mrb[19].mxu0 }
 0x330   : > { %v727_v29 = vpop.xlane.xlu1 %726 }
 0x331   : > { %v749_v30 = vsub.f32 %v375_v44, %v727_v29 }
 0x333   : > { %v757_v31 = vmul.f32 1.442695, %v749_v30 }
 0x335   : > { %870 = vrot.lane.b32.xlu1 %v2149_v16, %s1918_s24  ;;  %1713 = vpow2.f32 %v757_v31 }
 0x336   : > { %821 = vrot.lane.b32.xlu0 %v2146_v13, %s1918_s24 }
 0x339   : > { %918 = vrot.lane.b32.xlu1 %v2154_v20, %s1918_s24 }
 0x33a   : > { %966 = vrot.lane.b32.xlu0 %v2152_v19, %s1918_s24 }
 0x33d   : > { %1014 = vrot.lane.b32.xlu1 %v2158_v23, %s1918_s24 }
 0x33f   : > { %v2242_v32 = vpop.eup %1713 }
 0x340   : > { %v773_v16 = vsel %vm724_vm3, %v2242_v32, 0.0 }
 0x359   : > { %774 = vadd.xlane.f32.xlu0 %v773_v16 }
 0x399   : > { %v730_v13 = vpop.xlane.xlu0 %729 }
 0x39a   : > { %v750_v33 = vsub.f32 %v424_v49, %v730_v13 }
 0x39c   : > { %v759_v34 = vmul.f32 1.442695, %v750_v33 }
 0x39d   : > { %v733_v20 = vpop.xlane.xlu0 %732 }
 0x39e   : > { %1715 = vpow2.f32 %v759_v34  ;;  %v751_v35 = vsub.f32 %v473_v54, %v733_v20 }
 0x3a0   : > { %v761_v19 = vmul.f32 1.442695, %v751_v35 }
 0x3a1   : > { %v736_v36 = vpop.xlane.xlu1 %735 }
 0x3a2   : > { %1717 = vpow2.f32 %v761_v19  ;;  %v752_v23 = vsub.f32 %v522_v59, %v736_v36 }
 0x3a4   : > { %v763_v37 = vmul.f32 1.442695, %v752_v23 }
 0x3a5   : > { %v739_v39 = vpop.xlane.xlu0 %738 }
 0x3a6   : > { %1719 = vpow2.f32 %v763_v37  ;;  %v753_v60 = vsub.f32 %v2222_v1, %v739_v39 }
 0x3a8   : > { %v2246_v38 = vpop.eup %1715  ;;  %v765_v61 = vmul.f32 1.442695, %v753_v60 }
 0x3a9   : > { %v742_v40 = vpop.xlane.xlu1 %741  ;;  %v776_v41 = vsel %vm724_vm3, %v2246_v38, 0.0 }
 0x3aa   : > { %v754_v42 = vsub.f32 %v620_v6, %v742_v40  ;;  %777 = vadd.xlane.f32.xlu1 %v776_v41 }
 0x3ac   : > { %v2250_v43 = vpop.eup %1717  ;;  %v767_v44 = vmul.f32 1.442695, %v754_v42 }
 0x3ad   : > { %v745_v45 = vpop.xlane.xlu0 %744  ;;  %v779_v46 = vsel %vm724_vm3, %v2250_v43, 0.0 }
 0x3ae   : > { %1721 = vpow2.f32 %v767_v44  ;;  %780 = vadd.xlane.f32.xlu0 %v779_v46  ;;  %v755_v62 = vsub.f32 %v2227_v11, %v745_v45 }
 0x3b0   : > { %v2254_v47 = vpop.eup %1719  ;;  %v769_v63 = vmul.f32 1.442695, %v755_v62 }
 0x3b1   : > { %v822_v48 = vpop.permute.xlu0 %821  ;;  %v748_v49 = vpop.xlane.xlu1 %747  ;;  %v782_v50 = vsel %vm724_vm3, %v2254_v47, 0.0 }
 0x3b2   : > { %v828_v51 = vsel %vm826_vm4, %v822_v48, 0  ;;  %v756_v52 = vsub.f32 %v718_v18, %v748_v49  ;;  %783 = vadd.xlane.f32.xlu1 %v782_v50 }
 0x3b3   : > { %1571 = vmatpush3.bf16.msra.mxu1 %v828_v51 }
 0x3b4   : > { %v771_v53 = vmul.f32 1.442695, %v756_v52  ;;  %1582 = vmatprep.subr.bf16.mxu1 %v1908_v0 }
 0x3b5   : > { %v871_v54 = vpop.permute.xlu1 %870  ;;  %v967_v3 = vpop.permute.xlu0 %966 }
 0x3b6   : > { %1723 = vpow2.f32 %v771_v53  ;;  %v876_v55 = vsel %vm826_vm4, %v871_v54, 0  ;;  %v972_v22 = vsel %vm826_vm4, %v967_v3, 0 }
 0x3b7   : > { %1577 = vmatpush3.bf16.msra.mxu0 %v876_v55  ;;  %1725 = vpow2.f32 %v765_v61 }
 0x3b8   : > { %v2261_v56 = vpop.eup %1721  ;;  %1588 = vmatprep.subr.bf16.mxu0 %v1908_v0  ;;  %1727 = vpow2.f32 %v769_v63 }
 0x3b9   : > { %v788_v57 = vsel %vm724_vm3, %v2261_v56, 0.0  ;;  %v919_v7 = vpop.permute.xlu1 %918 }
 0x3ba   : > { %789 = vadd.xlane.f32.xlu1 %v788_v57  ;;  %v924_v9 = vsel %vm826_vm4, %v919_v7, 0 }
 0x3bd   : > { %v1015_v10 = vpop.permute.xlu1 %1014 }
 0x3be   : > { %v1020_v30 = vsel %vm826_vm4, %v1015_v10, 0 }
 0x3c0   : > { %v2266_v58 = vpop.eup %1723 }
 0x3c1   : > { %v794_v59 = vsel %vm724_vm3, %v2266_v58, 0.0  ;;  %v2276_v2 = vpop.eup %1725 }
 0x3c2   : > { %795 = vadd.xlane.f32.xlu1 %v794_v59  ;;  %v785_v4 = vsel %vm724_vm3, %v2276_v2, 0.0  ;;  %v2280_v5 = vpop.eup %1727 }
 0x3c3   : > { %v791_v1 = vsel %vm724_vm3, %v2280_v5, 0.0 }
 0x3c4   : > { %1062 = vrot.lane.b32.xlu0 %v2160_v24, %s1918_s24 }
 0x3d3   : > { %1110 = vrot.lane.b32.xlu1 %v2164_v27, %s1918_s24 }
 0x3e3   : > { %786 = vadd.xlane.f32.xlu0 %v785_v4 }
 0x3e6   : > { %v775_v24 = vpop.xlane.xlu0 %774 }
 0x3e7   : > { %1729 = vrcp.f32 %v775_v24  ;;  %792 = vadd.xlane.f32.xlu0 %v791_v1 }
 0x3f1   : > { %v1730_v6 = vpop.eup %1729 }
 0x3f2   : > { %v805_v27 = vmul.f32 %v1730_v6, %v2242_v32 }
 0x3f4   : > { %v813_v8 = vpack.c.bf16 %v805_v27, %v805_v27 }
 0x3f6   : > { %1573 = vmatmul.mubr.msk.bf16.vlgmr.msra.gmra.mrb[16].mxu1 %vm724_vm3, %v813_v8 }
 0x3f7   : > { %1583 = vmatpush3.bf16.msra.mxu1 %v924_v9  ;;  %1584 = vmatprep.mubr.msk.bf16.mxu1 %vm1909_vm0, %v1908_v0 }
 0x3f8   : > { %1594 = vmatprep.subr.bf16.mxu1 %v1908_v0 }
 0x3fd   : > { %1158 = vrot.lane.b32.xlu0 %v2166_v28, %s1918_s24  ;;  %s2338_s24 = scalar_lea.hbm %s2387_s4, %s1466_s30 }
 0x437   : > { %v778_v11 = vpop.xlane.xlu1 %777 }
 0x438   : > { %1731 = vrcp.f32 %v778_v11 }
 0x43b   : > { %v781_v12 = vpop.xlane.xlu0 %780 }
 0x43c   : > { %1733 = vrcp.f32 %v781_v12  ;;  %v248_v12 = vld [vmem:[#allocation8] sm:$0xff] }
 0x43f   : > { %v784_v14 = vpop.xlane.xlu1 %783  ;;  %v1063_v32 = vpop.permute.xlu0 %1062 }
 0x440   : > { %1735 = vrcp.f32 %v784_v14  ;;  %v1068_v13 = vsel %vm826_vm4, %v1063_v32, 0  ;;  %v249_v14 = vld [vmem:[#allocation8 + $0x8] sm:$0xff] }
 0x442   : > { %v1732_v15 = vpop.eup %1731 }
 0x443   : > { %v806_v17 = vmul.f32 %v1732_v15, %v2246_v38 }
 0x445   : > { %v814_v18 = vpack.c.bf16 %v806_v17, %v806_v17  ;;  %v255_v17 = vpack.c.bf16 %v249_v14, %v248_v12 }
 0x446   : > { %v1734_v21 = vpop.eup %1733 }
 0x447   : > { %v807_v25 = vmul.f32 %v1734_v21, %v2250_v43  ;;  %1579 = vmatmul.mubr.msk.bf16.vlgmr.msra.gmra.mrb[20].mxu0 %vm724_vm3, %v814_v18  ;;  %v790_v26 = vpop.xlane.xlu1 %789  ;;  %v250_v18 = vld [vmem:[#allocation8 + $0x10] sm:$0xff]  ;;  %v251_v21 = vld [vmem:[#allocation8 + $0x18] sm:$0xff] }
 0x448   : > { %1589 = vmatpush3.bf16.msra.mxu0 %v972_v22  ;;  %1737 = vrcp.f32 %v790_v26  ;;  %1590 = vmatprep.mubr.msk.bf16.mxu0 %vm1909_vm0, %v1908_v0 }
 0x449   : > { %v815_v28 = vpack.c.bf16 %v807_v25, %v807_v25  ;;  %1600 = vmatprep.subr.bf16.mxu0 %v1908_v0 }
 0x44a   : > { %v1736_v29 = vpop.eup %1735 }
 0x44b   : > { %v808_v31 = vmul.f32 %v1736_v29, %v2254_v47  ;;  %1585 = vmatmul.mubr.msk.bf16.vlgmr.msra.gmra.mrb[20].mxu1 %vm724_vm3, %v815_v28  ;;  %v256_v29 = vpack.c.bf16 %v251_v21, %v250_v18 }
 0x44c   : > { %1595 = vmatpush3.bf16.msra.mxu1 %v1020_v30  ;;  %1596 = vmatprep.mubr.msk.bf16.mxu1 %vm1909_vm0, %v1908_v0 }
 0x44d   : > { %v816_v16 = vpack.c.bf16 %v808_v31, %v808_v31  ;;  %1606 = vmatprep.subr.bf16.mxu1 %v1908_v0 }
 0x44f   : > { %1591 = vmatmul.mubr.msk.bf16.vlgmr.msra.gmra.mrb[24].mxu0 %vm724_vm3, %v816_v16  ;;  %v796_v35 = vpop.xlane.xlu1 %795 }
 0x450   : > { %1601 = vmatpush3.bf16.msra.mxu0 %v1068_v13  ;;  %1602 = vmatprep.mubr.msk.bf16.mxu0 %vm1909_vm0, %v1908_v0  ;;  %1739 = vrcp.f32 %v796_v35 }
 0x451   : > { %1612 = vmatprep.subr.bf16.mxu0 %v1908_v0 }
 0x452   : > { %v1738_v33 = vpop.eup %1737 }
 0x453   : > { %v810_v34 = vmul.f32 %v1738_v33, %v2261_v56  ;;  %v1111_v43 = vpop.permute.xlu1 %1110 }
 0x454   : > { %v1116_v46 = vsel %vm826_vm4, %v1111_v43, 0 }
 0x455   : > { %v818_v20 = vpack.c.bf16 %v810_v34, %v810_v34 }
 0x457   : > { %1603 = vmatmul.mubr.msk.bf16.vlgmr.msra.gmra.mrb[28].mxu0 %vm724_vm3, %v818_v20 }
 0x458   : > { %1614 = vmatprep.mubr.msk.bf16.mxu0 %vm1909_vm0, %v1908_v0 }
 0x45a   : > { %v1740_v36 = vpop.eup %1739 }
 0x45b   : > { %v812_v37 = vmul.f32 %v1740_v36, %v2266_v58 }
 0x45d   : > { %v820_v41 = vpack.c.bf16 %v812_v37, %v812_v37 }
 0x470   : > { %v787_v19 = vpop.xlane.xlu0 %786 }
 0x471   : > { %1741 = vrcp.f32 %v787_v19 }
 0x474   : > { %v793_v23 = vpop.xlane.xlu0 %792 }
 0x475   : > { %1743 = vrcp.f32 %v793_v23 }
 0x478   : > { %v1159_v38 = vpop.permute.xlu0 %1158 }
 0x479   : > { %v1164_v39 = vsel %vm826_vm4, %v1159_v38, 0 }
 0x47a   : > { %1613 = vmatpush3.bf16.msra.mxu0 %v1164_v39  ;;  %v1463_v39 = vld [vmem:[%s2386_s3] ss:$0 sm:$0xff] }
 0x47b   : > { %v1742_v40 = vpop.eup %1741 }
 0x47c   : > { %v809_v42 = vmul.f32 %v1742_v40, %v2276_v2 }
 0x47d   : > { %1615 = vmatmul.mubr.msk.bf16.vlgmr.msra.gmra.mrb[32].mxu0 %vm724_vm3, %v820_v41 }
 0x47e   : > { %v817_v44 = vpack.c.bf16 %v809_v42, %v809_v42 }
 0x47f   : > { %v1744_v45 = vpop.eup %1743 }
 0x480   : > { %1597 = vmatmul.mubr.msk.bf16.vlgmr.msra.gmra.mrb[24].mxu1 %vm724_vm3, %v817_v44  ;;  %v811_v47 = vmul.f32 %v1744_v45, %v2280_v5 }
 0x481   : > { %1607 = vmatpush3.bf16.msra.mxu1 %v1116_v46  ;;  %1608 = vmatprep.mubr.msk.bf16.mxu1 %vm1909_vm0, %v1908_v0 }
 0x482   : > { %1618 = vmatprep.subr.bf16.mxu1 %v1908_v0  ;;  %v819_v48 = vpack.c.bf16 %v811_v47, %v811_v47 }
 0x488   : > { %1609 = vmatmul.mubr.msk.bf16.vlgmr.msra.gmra.mrb[28].mxu1 %vm724_vm3, %v819_v48 }
 0x489   : > { %1622 = vmatprep.mubr.msk.bf16.mxu1 %vm1909_vm0, %v1908_v0  ;;  %1619 = vmatpush3.bf16.msra.mxu1 %v255_v17 }
 0x48a   : > { %1620 = vmatprep.subr.bf16.mxu1 %v1908_v0 }
 0x48d   : > { %1621 = vmatpush3.bf16.msra.mxu1 %v256_v29 }
 0x4c9   : > { %v864_v49 = vpop.f32.mrb[16].mxu1 }
 0x4ca   : > { %v1206_v50 = vpack.c.bf16 %v864_v49, %v864_v49  ;;  %v1574_v51 = vpop.f32.mrb[17].mxu1 }
 0x4cb   : > { %v867_v52 = vpop.f32.mrb[18].mxu1 }
 0x4cc   : > { %1208 = vst.msk [vmem:[#allocation2] sm:$0xf] %vm1207_vm5, %v1206_v50  ;;  %v1575_v53 = vpop.f32.mrb[19].mxu1 }
 0x51a   : > { %v912_v54 = vpop.f32.mrb[20].mxu0 }
 0x51b   : > { %v1469_v55 = vpack.c.bf16 %v912_v54, %v912_v54  ;;  %v1580_v56 = vpop.f32.mrb[21].mxu0 }
 0x51c   : > { %v915_v57 = vpop.f32.mrb[22].mxu0 }
 0x51d   : > { %1213 = vrot.lane.b32.xlu1 %v1469_v55, %s1919_s20  ;;  %v1581_v58 = vpop.f32.mrb[23].mxu0  ;;  %s1926_s20 = smov [#allocation9]  }
 0x51e   : > { %v960_v59 = vpop.f32.mrb[20].mxu1 }
 0x51f   : > { %v1470_v60 = vpack.c.bf16 %v960_v59, %v960_v59  ;;  %v1586_v61 = vpop.f32.mrb[21].mxu1 }
 0x520   : > { %v963_v62 = vpop.f32.mrb[22].mxu1 }
 0x521   : > { %1222 = vrot.lane.b32.xlu0 %v1470_v60, %s1920_s28  ;;  %v1587_v63 = vpop.f32.mrb[23].mxu1  ;;  %s1835_s28 = sshll.u32 %s1926_s20, 4  ;;  %s1836_s28 = int_to_ptr.vmem [resolvable:$false] %s1835_s28 }
 0x522   : > { %v1008_v2 = vpop.f32.mrb[24].mxu0  ;;  %p1838_p7 = scmp.lt.s32.totalorder %s2340_s6, %s1836_s28 }
 0x523   : > { %v1471_v3 = vpack.c.bf16 %v1008_v2, %v1008_v2  ;;  %v1592_v4 = vpop.f32.mrb[25].mxu0 }
 0x524   : > { %v1011_v5 = vpop.f32.mrb[26].mxu0 }
 0x525   : > { %1231 = vrot.lane.b32.xlu1 %v1471_v3, %s1921_s11  ;;  %v1593_v24 = vpop.f32.mrb[27].mxu0  ;;  %s1837_s11 = scalar_lea.vmem %s1836_s28, 256 }
 0x526   : > { %p1839_p9 = scmp.lt.s32.totalorder %s1837_s11, %s1831_s25 }
 0x528   : > { %p1840_p12 = por %p1839_p9, %p1838_p7 }
 0x52a   : > { %v1104_v1 = vpop.f32.mrb[28].mxu0  ;;  %p1841_p2 = pnand %p1840_p12, %p1834_p3 }
 0x52b   : > { %v1473_v6 = vpack.c.bf16 %v1104_v1, %v1104_v1  ;;  %v1604_v27 = vpop.f32.mrb[29].mxu0 }
 0x52c   : > { %v1107_v7 = vpop.f32.mrb[30].mxu0 }
 0x52d   : > { %1249 = vrot.lane.b32.xlu1 %v1473_v6, %s1922_s12  ;;  %v1605_v8 = vpop.f32.mrb[31].mxu0 }
 0x550   : > { %v1200_v9 = vpop.f32.mrb[32].mxu0 }
 0x551   : > { %v1475_v10 = vpack.c.bf16 %v1200_v9, %v1200_v9  ;;  %v1616_v11 = vpop.f32.mrb[33].mxu0 }
 0x552   : > { %v1203_v15 = vpop.f32.mrb[34].mxu0 }
 0x553   : > { %v1056_v22 = vpop.f32.mrb[24].mxu1  ;;  %1267 = vrot.lane.b32.xlu1 %v1475_v10, %s1923_s7  ;;  %v1617_v25 = vpop.f32.mrb[35].mxu0 }
 0x554   : > { %v1472_v26 = vpack.c.bf16 %v1056_v22, %v1056_v22  ;;  %v1598_v28 = vpop.f32.mrb[25].mxu1 }
 0x555   : > { %v1059_v30 = vpop.f32.mrb[26].mxu1 }
 0x556   : > { %1240 = vrot.lane.b32.xlu0 %v1472_v26, %s1924_s8  ;;  %v1599_v31 = vpop.f32.mrb[27].mxu1 }
 0x55b   : > { %v1152_v32 = vpop.f32.mrb[28].mxu1 }
 0x55c   : > { %v1474_v16 = vpack.c.bf16 %v1152_v32, %v1152_v32  ;;  %v1610_v13 = vpop.f32.mrb[29].mxu1 }
 0x55d   : > { %v1155_v33 = vpop.f32.mrb[30].mxu1 }
 0x55e   : > { %1258 = vrot.lane.b32.xlu0 %v1474_v16, %s1925_s21  ;;  %v1611_v34 = vpop.f32.mrb[31].mxu1 }
 0x58f   : > { %v1214_v20 = vpop.permute.xlu1 %1213 }
 0x590   : > { %1217 = vst.msk [vmem:[#allocation2] sm:$0xf] %vm1216_vm6, %v1214_v20 }
 0x593   : > { %v1223_v35 = vpop.permute.xlu0 %1222 }
 0x594   : > { %1226 = vst.msk [vmem:[#allocation2] sm:$0xf] %vm1225_vm7, %v1223_v35 }
 0x597   : > { %v1232_v19 = vpop.permute.xlu1 %1231 }
 0x598   : > { %1235 = vst.msk [vmem:[#allocation2] sm:$0xf] %vm1234_vm8, %v1232_v19 }
 0x59f   : > { %v1250_v36 = vpop.permute.xlu1 %1249 }
 0x5c5   : > { %v1268_v37 = vpop.permute.xlu1 %1267 }
 0x5c8   : > { %v1241_v0 = vpop.permute.xlu0 %1240 }
 0x5c9   : > { %1244 = vst.msk [vmem:[#allocation2] sm:$0xf] %vm1243_vm9, %v1241_v0 }
 0x5ca   : > { %1253 = vst.msk [vmem:[#allocation2] sm:$0xf] %vm1252_vm10, %v1250_v36 }
 0x5d0   : > { %v1259_v23 = vpop.permute.xlu0 %1258 }
 0x5d1   : > { %1262 = vst.msk [vmem:[#allocation2] sm:$0xf] %vm1261_vm11, %v1259_v23 }
 0x5d2   : > { %1271 = vst.msk [vmem:[#allocation2] sm:$0xf] %vm1270_vm12, %v1268_v37 }
 0x5d9   : > { %v1272_v38 = vld [vmem:[#allocation2] sm:$0xf] }
 0x5da   : > { %1623 = vmatmul.mubr.msk.bf16.vlgmr.msra.gmra.mrb[32].mxu1 %vm257_vm1, %v1272_v38 }
 0x6ad   : > { %v1317_v40 = vpop.f32.mrb[32].mxu1 }
 0x6ae   : > { %v1318_v41 = vadd.f32 %v1463_v39, %v1317_v40  ;;  %v1624_v42 = vpop.f32.mrb[33].mxu1 }
 0x6af   : > { %v1320_v43 = vpop.f32.mrb[34].mxu1 }
 0x6b0   : > { %v1625_v44 = vpop.f32.mrb[35].mxu1  ;;  %1323 = vst.msk [vmem:[%s241_s5] sm:$0xff] %vm257_vm1, %v1318_v41 }
 0x6b1   : > { %1844 = shalt.err (!%p1841_p2)
}
 0x6b2   : > { %s1845_s29 = scalar_lea.hbm %s2338_s24, 128  ;;  %s1849_s8 = scalar_lea.hbm %s2387_s4, 256 }
 0x6b3   : > { %p1846_p13 = scmp.ne.s32.totalorder %s2338_s24, %s1845_s29  ;;  %p1850_p4 = scmp.lt.u32.totalorder %s2338_s24, %s2387_s4 }
 0x6b4   : > { %p1851_p5 = scmp.lt.u32.totalorder %s1849_s8, %s1845_s29  ;;  %p1853_p11 = scmp.lt.u32.totalorder %s1845_s29, %s2338_s24 }
 0x6b5   : > { %p1847_p6 = pnand %p1846_p13, %p2401_p0 }
 0x6b6   : > { %p1852_p8 = por %p1851_p5, %p1850_p4 }
 0x6b7   : > { %p1848_p10 = pneg %p1847_p6 }
 0x6b8   : > { %p1854_p1 = por %p1853_p11, %p1852_p8 }
 0x6ba   : > { %p1855_p3 = pnand %p1854_p1, %p1848_p10 }
 0x6bc   : > { %1858 = shalt.err (!%p1855_p3)
}
 0x6bd   : > { %1636 = dma.vmem_to_hbm [thread:$0]  (%p2401_p0), %s2340_s6, 128, %s2338_s24, %s1325_s19  }
 0x6be PF: > { %s1350_s27 = sand.u32 1, %s1889_s15   ;;  %p2402_p7 = scmp.ne.s32.totalorder %s2392_s22, 0 }
 0x6bf   : > { %p2403_p9 = scmp.ge.s32.totalorder %s1901_s18, 2  ;;  %s1351_s30 = scalar_lea.sflag [#allocation5], %s1350_s27 }
 0x6c1   : > { %p1650_p12 = pnand %p2403_p9, %p2402_p7 }
 0x6c3   : > { %1884 = dma.done.wait (!%p1650_p12), %s1351_s30, 128  }
 0x6c4   : > { %1886 = vsyncadd (!%p1650_p12), %s1351_s30, 4294967168  ;;  %p18_p2 = scmp.ge.s32.totalorder %s2062_s9, 4   ;;  %s2404_s15 = smov %s1893_s16 }
 0x6c5   : > { %s2405_s16 = smov %s1897_s17  ;;  %s2406_s17 = smov %s2078_s14 }
 0x6c6   : > { %s2407_s18 = smov %s2062_s9  ;;  %20 = sbr.rel (!%p18_p2) target bundleno = 6 (0x6), region = 89 }
 0x6cd   :  { %1356 = vsyncpa [#allocation4], 1 }
 0x6ce   :  { %1358 = vsyncpa [#allocation4 + $0x1], 1 }
 0x6cf   :  { %1359 = vsyncpa [#allocation7], 1 }
 0x6d0   :  { %1360 = vsyncpa [#allocation5], 1 }
 0x6d1   :  { %1362 = vsyncpa [#allocation5 + $0x1], 1 }

</bundles_post_ra>
